<compile_context>
chip_gen: v7x
topology: tpu7x:2x2x1
jax: 0.10.0
libtpu: 0.0.40
codegen_flags: <defaults>
</compile_context>

<pallas_src>
import functools

import jax
import jax.numpy as jnp
from jax.experimental import pallas as pl
from jax.experimental.pallas import tpu as pltpu

IN_CHANNELS = 80   # d_model of the module (nn.Linear(80, 80) chain)
NUM_LINEAR = 5     # fc, fc1, fc2, fc3, fc_out per MelShiftNetwork


def _round_up(x, m):
    return ((x + m - 1) // m) * m


def _cdiv(a, b):
    return -(-a // b)


# ---------------------------------------------------------------------------
# Pallas kernel
# ---------------------------------------------------------------------------
def _generator_kernel(x_ref, w0_ref, w_ref, b_ref, o_ref, *, n_split):
    """One (C, tt) tile of the fused Generator forward.

    x_ref:  (C, tt)        f32  input tile (channels on sublanes, time on lanes)
    w0_ref: (2C, C)        bf16 stacked [W_up0 ; W_dn0] (layer 0, y = W @ x)
    w_ref:  (4, 2C, 2C)    bf16 block-diagonal fused weights for fc1..fc_out
    b_ref:  (5, 2C, 1)     f32  fused biases
    o_ref:  (C, tt)        f32  output tile
    """
    c, tt = x_ref.shape
    chunk = tt // n_split

    w0 = w0_ref[...]                                    # (2C, C)
    w_layers = [w_ref[i] for i in range(NUM_LINEAR - 1)]
    biases = [b_ref[i] for i in range(NUM_LINEAR)]      # each (2C, 1)

    # Static unroll over independent column halves -> two independent
    # dependency chains in one basic block, letting the scheduler overlap
    # MXU matmuls of one half with the VPU epilogue of the other.
    for s in range(n_split):
        lo, hi = s * chunk, (s + 1) * chunk
        x0 = x_ref[:, lo:hi].astype(jnp.float32)        # (C, chunk)
        xx0 = jnp.concatenate([x0, x0], axis=0)         # (2C, chunk) residual

        # Layer 0 (fc): stacked (2C, C) @ (C, chunk) directly on x0.
        y = jnp.dot(w0, x0.astype(jnp.bfloat16),
                    preferred_element_type=jnp.float32) + biases[0]
        x = jnp.maximum(y, 0.0) + xx0                   # relu(fc(x)) + x

        # Layers 1..3 (fc1, fc2, fc3): block-diagonal, x = relu(y + x)
        for i in range(1, 4):
            y = jnp.dot(w_layers[i - 1], x.astype(jnp.bfloat16),
                        preferred_element_type=jnp.float32) + biases[i]
            x = jnp.maximum(y + x, 0.0)

        # Layer 4 (fc_out): no relu / residual
        x = jnp.dot(w_layers[3], x.astype(jnp.bfloat16),
                    preferred_element_type=jnp.float32) + biases[4]

        up = x[:c]                                      # shift_up
        dn = x[c:]                                      # shift_dn
        out = jnp.maximum(up, 0.0) + x0 - jnp.maximum(dn, 0.0)
        o_ref[:, lo:hi] = out.astype(o_ref.dtype)
    # (TransformerEncoder stacks of MelShiftNetwork are dead code in the
    #  reference forward and intentionally omitted.)


# ---------------------------------------------------------------------------
# Parameter packing
# ---------------------------------------------------------------------------
def pack_generator_params(up_w, up_b, dn_w, dn_b, compute_dtype=jnp.bfloat16):
    """Builds the fused parameters used by the kernel.

    up_w/dn_w: (5, C, C) in PyTorch nn.Linear orientation (y = W @ x_col + b)
    up_b/dn_b: (5, C)
    Returns:
      w0:     (2C, C)      compute_dtype   stacked layer-0 weights
      w_rest: (4, 2C, 2C)  compute_dtype   block-diagonal fc1..fc_out weights
      b:      (5, 2C, 1)   f32             fused biases
    """
    n_lin, c, _ = up_w.shape
    w0 = jnp.concatenate([up_w[0], dn_w[0]], axis=0).astype(compute_dtype)
    w = jnp.zeros((n_lin - 1, 2 * c, 2 * c), jnp.float32)
    w = w.at[:, :c, :c].set(up_w[1:].astype(jnp.float32))
    w = w.at[:, c:, c:].set(dn_w[1:].astype(jnp.float32))
    b = jnp.concatenate([up_b, dn_b], axis=-1)[..., None]   # (5, 2C, 1)
    return w0, w.astype(compute_dtype), b.astype(jnp.float32)


# ---------------------------------------------------------------------------
# Wrapper
# ---------------------------------------------------------------------------
@functools.partial(jax.jit, static_argnames=("max_t_tile",))
def generator_forward(x_bct, w0, w_rest, b_fused, *, max_t_tile=2048):
    """x_bct: (B, C, T) float32.  Returns (B, C, T) in x_bct.dtype."""
    B, C, T = x_bct.shape
    c2 = w0.shape[0]
    assert c2 == 2 * C and w0.shape == (c2, C)
    assert w_rest.shape == (NUM_LINEAR - 1, c2, c2)
    assert b_fused.shape == (NUM_LINEAR, c2, 1)

    # --- time-tile (lane axis) selection -----------------------------------
    if T < 128:
        tt = T                               # full-dim block (lanes == T)
    else:
        max_tt = _round_up(max(int(max_t_tile), 128), 128)
        t128 = _round_up(T, 128)
        tt = min(max_tt, t128)
        # Keep >= 2 parallel grid steps when possible (v7x has 2 TensorCores).
        if B * _cdiv(T, tt) < 2 and t128 >= 256:
            tt = _round_up(_cdiv(t128, 2), 128)
    nt = _cdiv(T, tt)
    n_split = 2 if (tt % 256 == 0) else 1    # independent halves for overlap

    # (B, C, T) -> (B*C, T): contiguous reshape, no data movement, no padding.
    x_rows = x_bct.astype(jnp.float32).reshape(B * C, T)

    # Put the larger parallel extent first in the grid (megacore sharding).
    if nt >= B:
        grid = (nt, B)
        x_index = lambda t, b: (b, t)
    else:
        grid = (B, nt)
        x_index = lambda b, t: (b, t)

    x_spec = pl.BlockSpec((C, tt), x_index)
    w0_spec = pl.BlockSpec((c2, C), lambda i, j: (0, 0))
    w_spec = pl.BlockSpec((NUM_LINEAR - 1, c2, c2), lambda i, j: (0, 0, 0))
    b_spec = pl.BlockSpec((NUM_LINEAR, c2, 1), lambda i, j: (0, 0, 0))

    out_rows = pl.pallas_call(
        functools.partial(_generator_kernel, n_split=n_split),
        out_shape=jax.ShapeDtypeStruct((B * C, T), jnp.float32),
        grid_spec=pltpu.PrefetchScalarGridSpec(
            num_scalar_prefetch=0,
            grid=grid,
            in_specs=[x_spec, w0_spec, w_spec, b_spec],
            out_specs=x_spec,
        ),
        compiler_params=pltpu.CompilerParams(
            dimension_semantics=("parallel", "parallel"),
            vmem_limit_bytes=48 * 1024 * 1024),
    )(x_rows, w0, w_rest, b_fused)

    return out_rows.reshape(B, C, T).astype(x_bct.dtype)


# ---------------------------------------------------------------------------
# Pure-JAX reference (for validation)
# ---------------------------------------------------------------------------
def generator_ref(x_bct, up_w, up_b, dn_w, dn_b, *, matmul_dtype=jnp.float32):
    """Reference Generator forward.  matmul_dtype=bfloat16 mimics the kernel's
    MXU precision (f32 accumulation); float32 matches PyTorch f32 semantics."""
    x = jnp.transpose(x_bct, (0, 2, 1)).astype(jnp.float32)  # b c t -> b t c
    x0 = x

    def lin(v, w, b):
        return jnp.dot(v.astype(matmul_dtype), w.T.astype(matmul_dtype),
                       preferred_element_type=jnp.float32) + b

    def chain(x, w, b):
        y = lin(x, w[0], b[0]); x = jnp.maximum(y, 0.0) + x
        y = lin(x, w[1], b[1]); x = jnp.maximum(y + x, 0.0)
        y = lin(x, w[2], b[2]); x = jnp.maximum(y + x, 0.0)
        y = lin(x, w[3], b[3]); x = jnp.maximum(y + x, 0.0)
        return lin(x, w[4], b[4])

    up = chain(x, up_w, up_b)
    dn = chain(x, dn_w, dn_b)
    out = jnp.maximum(up, 0.0) + x0 - jnp.maximum(dn, 0.0)
    return jnp.transpose(out, (0, 2, 1))                     # b t c -> b c t


# ---------------------------------------------------------------------------
# Self-test
# ---------------------------------------------------------------------------
if __name__ == "__main__":
    C = IN_CHANNELS

    key = jax.random.PRNGKey(0)
    k_uw, k_ub, k_dw, k_db, k_x = jax.random.split(key, 5)

    # Per-net parameters in PyTorch nn.Linear orientation.
    up_w = jax.random.normal(k_uw, (NUM_LINEAR, C, C), jnp.float32) * 0.05
    up_b = jax.random.normal(k_ub, (NUM_LINEAR, C), jnp.float32) * 0.05
    dn_w = jax.random.normal(k_dw, (NUM_LINEAR, C, C), jnp.float32) * 0.05
    dn_b = jax.random.normal(k_db, (NUM_LINEAR, C), jnp.float32) * 0.05

    w0, w_rest, b_fused = pack_generator_params(up_w, up_b, dn_w, dn_b)

    # Cases exercise: tiny T (full-dim block), ragged T with a partial
    # boundary block (no wrapper padding), and the 2-way column split path.
    cases = [(2, 16), (1, 200), (1, 512)]
    for idx, (B, T) in enumerate(cases):
        kx = jax.random.fold_in(k_x, idx)
        x = jax.random.normal(kx, (B, C, T), jnp.float32)

        out = generator_forward(x, w0, w_rest, b_fused)
        out = jax.block_until_ready(out)
        assert out.shape == (B, C, T)

        # Precision-matched reference (bf16 MXU inputs, f32 accumulation).
        ref_bf16 = generator_ref(x, up_w, up_b, dn_w, dn_b,
                                 matmul_dtype=jnp.bfloat16)
        assert jnp.allclose(out, ref_bf16, atol=2e-3, rtol=2e-3), \
            f"case {B}x{T}: mismatch vs precision-matched reference"

        # Full-f32 semantics check (looser tolerance: bf16 MXU inputs).
        ref_f32 = generator_ref(x, up_w, up_b, dn_w, dn_b,
                                matmul_dtype=jnp.float32)
        assert jnp.allclose(out, ref_f32, atol=1e-1, rtol=1e-1), \
            f"case {B}x{T}: mismatch vs f32 reference"

    print("KERNEL_OK")
</pallas_src>

<mosaic_0001>
module attributes {stable_mosaic.version = 11 : i64} {
  func.func @_generator_kernel(%arg0: i32, %arg1: i32, %arg2: memref<80x16xf32, #tpu.memory_space<vmem>>, %arg3: memref<160x80xbf16, #tpu.memory_space<vmem>>, %arg4: memref<4x160x160xbf16, #tpu.memory_space<vmem>>, %arg5: memref<5x160x1xf32, #tpu.memory_space<vmem>>, %arg6: memref<80x16xf32, #tpu.memory_space<vmem>>) attributes {dimension_semantics = [#tpu.dimension_semantics<parallel>, #tpu.dimension_semantics<parallel>], iteration_bounds = array<i64: 2, 1>, scalar_prefetch = 0 : i64, scratch_operands = 0 : i64, tpu.core_type = #tpu.core_type<tc>, window_params = [{transform_indices = @transform_0, window_bounds = array<i64: 80, 16>}, {pipeline_mode = #tpu.pipeline_mode<synchronous>, transform_indices = @transform_1, window_bounds = array<i64: 160, 80>}, {pipeline_mode = #tpu.pipeline_mode<synchronous>, transform_indices = @transform_2, window_bounds = array<i64: 4, 160, 160>}, {pipeline_mode = #tpu.pipeline_mode<synchronous>, transform_indices = @transform_3, window_bounds = array<i64: 5, 160, 1>}, {transform_indices = @transform_4, window_bounds = array<i64: 80, 16>}]} {
    %c0 = arith.constant 0 : index
    %c0_0 = arith.constant 0 : index
    %0 = vector.load %arg3[%c0, %c0_0] : memref<160x80xbf16, #tpu.memory_space<vmem>>, vector<160x80xbf16>
    %c0_1 = arith.constant 0 : index
    %c0_2 = arith.constant 0 : index
    %c0_3 = arith.constant 0 : index
    %1 = vector.load %arg4[%c0_1, %c0_2, %c0_3] : memref<4x160x160xbf16, #tpu.memory_space<vmem>>, vector<1x160x160xbf16>
    %2 = vector.shape_cast %1 : vector<1x160x160xbf16> to vector<160x160xbf16>
    %c1 = arith.constant 1 : index
    %c0_4 = arith.constant 0 : index
    %c0_5 = arith.constant 0 : index
    %3 = vector.load %arg4[%c1, %c0_4, %c0_5] : memref<4x160x160xbf16, #tpu.memory_space<vmem>>, vector<1x160x160xbf16>
    %4 = vector.shape_cast %3 : vector<1x160x160xbf16> to vector<160x160xbf16>
    %c2 = arith.constant 2 : index
    %c0_6 = arith.constant 0 : index
    %c0_7 = arith.constant 0 : index
    %5 = vector.load %arg4[%c2, %c0_6, %c0_7] : memref<4x160x160xbf16, #tpu.memory_space<vmem>>, vector<1x160x160xbf16>
    %6 = vector.shape_cast %5 : vector<1x160x160xbf16> to vector<160x160xbf16>
    %c3 = arith.constant 3 : index
    %c0_8 = arith.constant 0 : index
    %c0_9 = arith.constant 0 : index
    %7 = vector.load %arg4[%c3, %c0_8, %c0_9] : memref<4x160x160xbf16, #tpu.memory_space<vmem>>, vector<1x160x160xbf16>
    %8 = vector.shape_cast %7 : vector<1x160x160xbf16> to vector<160x160xbf16>
    %c0_10 = arith.constant 0 : index
    %c0_11 = arith.constant 0 : index
    %c0_12 = arith.constant 0 : index
    %9 = vector.load %arg5[%c0_10, %c0_11, %c0_12] : memref<5x160x1xf32, #tpu.memory_space<vmem>>, vector<1x160x1xf32>
    %10 = vector.shape_cast %9 : vector<1x160x1xf32> to vector<160x1xf32>
    %c1_13 = arith.constant 1 : index
    %c0_14 = arith.constant 0 : index
    %c0_15 = arith.constant 0 : index
    %11 = vector.load %arg5[%c1_13, %c0_14, %c0_15] : memref<5x160x1xf32, #tpu.memory_space<vmem>>, vector<1x160x1xf32>
    %12 = vector.shape_cast %11 : vector<1x160x1xf32> to vector<160x1xf32>
    %c2_16 = arith.constant 2 : index
    %c0_17 = arith.constant 0 : index
    %c0_18 = arith.constant 0 : index
    %13 = vector.load %arg5[%c2_16, %c0_17, %c0_18] : memref<5x160x1xf32, #tpu.memory_space<vmem>>, vector<1x160x1xf32>
    %14 = vector.shape_cast %13 : vector<1x160x1xf32> to vector<160x1xf32>
    %c3_19 = arith.constant 3 : index
    %c0_20 = arith.constant 0 : index
    %c0_21 = arith.constant 0 : index
    %15 = vector.load %arg5[%c3_19, %c0_20, %c0_21] : memref<5x160x1xf32, #tpu.memory_space<vmem>>, vector<1x160x1xf32>
    %16 = vector.shape_cast %15 : vector<1x160x1xf32> to vector<160x1xf32>
    %c4 = arith.constant 4 : index
    %c0_22 = arith.constant 0 : index
    %c0_23 = arith.constant 0 : index
    %17 = vector.load %arg5[%c4, %c0_22, %c0_23] : memref<5x160x1xf32, #tpu.memory_space<vmem>>, vector<1x160x1xf32>
    %18 = vector.shape_cast %17 : vector<1x160x1xf32> to vector<160x1xf32>
    %c0_24 = arith.constant 0 : index
    %c0_25 = arith.constant 0 : index
    %19 = vector.load %arg2[%c0_24, %c0_25] : memref<80x16xf32, #tpu.memory_space<vmem>>, vector<80x16xf32>
    %20 = tpu.concatenate %19, %19 in 0 : vector<80x16xf32>, vector<80x16xf32> -> vector<160x16xf32>
    %21 = arith.truncf %19 : vector<80x16xf32> to vector<80x16xbf16>
    %cst = arith.constant dense<0.000000e+00> : vector<160x16xf32>
    %22 = tpu.matmul %0, %21, %cst {dimension_numbers = #tpu.dot_dimension_numbers<[1], [0], [0], [1], [0, 0, 1, 1], [], []>} : vector<160x80xbf16>, vector<80x16xbf16>, vector<160x16xf32> -> vector<160x16xf32>
    %23 = vector.broadcast %10 : vector<160x1xf32> to vector<160x16xf32>
    %24 = arith.addf %22, %23 : vector<160x16xf32>
    %cst_26 = arith.constant 0.000000e+00 : f32
    %25 = vector.broadcast %cst_26 : f32 to vector<160x16xf32>
    %26 = arith.maximumf %24, %25 : vector<160x16xf32>
    %27 = arith.addf %26, %20 : vector<160x16xf32>
    %28 = arith.truncf %27 : vector<160x16xf32> to vector<160x16xbf16>
    %cst_27 = arith.constant dense<0.000000e+00> : vector<160x16xf32>
    %29 = tpu.matmul %2, %28, %cst_27 {dimension_numbers = #tpu.dot_dimension_numbers<[1], [0], [0], [1], [0, 0, 1, 1], [], []>} : vector<160x160xbf16>, vector<160x16xbf16>, vector<160x16xf32> -> vector<160x16xf32>
    %30 = vector.broadcast %12 : vector<160x1xf32> to vector<160x16xf32>
    %31 = arith.addf %29, %30 : vector<160x16xf32>
    %32 = arith.addf %31, %27 : vector<160x16xf32>
    %cst_28 = arith.constant 0.000000e+00 : f32
    %33 = vector.broadcast %cst_28 : f32 to vector<160x16xf32>
    %34 = arith.maximumf %32, %33 : vector<160x16xf32>
    %35 = arith.truncf %34 : vector<160x16xf32> to vector<160x16xbf16>
    %cst_29 = arith.constant dense<0.000000e+00> : vector<160x16xf32>
    %36 = tpu.matmul %4, %35, %cst_29 {dimension_numbers = #tpu.dot_dimension_numbers<[1], [0], [0], [1], [0, 0, 1, 1], [], []>} : vector<160x160xbf16>, vector<160x16xbf16>, vector<160x16xf32> -> vector<160x16xf32>
    %37 = vector.broadcast %14 : vector<160x1xf32> to vector<160x16xf32>
    %38 = arith.addf %36, %37 : vector<160x16xf32>
    %39 = arith.addf %38, %34 : vector<160x16xf32>
    %cst_30 = arith.constant 0.000000e+00 : f32
    %40 = vector.broadcast %cst_30 : f32 to vector<160x16xf32>
    %41 = arith.maximumf %39, %40 : vector<160x16xf32>
    %42 = arith.truncf %41 : vector<160x16xf32> to vector<160x16xbf16>
    %cst_31 = arith.constant dense<0.000000e+00> : vector<160x16xf32>
    %43 = tpu.matmul %6, %42, %cst_31 {dimension_numbers = #tpu.dot_dimension_numbers<[1], [0], [0], [1], [0, 0, 1, 1], [], []>} : vector<160x160xbf16>, vector<160x16xbf16>, vector<160x16xf32> -> vector<160x16xf32>
    %44 = vector.broadcast %16 : vector<160x1xf32> to vector<160x16xf32>
    %45 = arith.addf %43, %44 : vector<160x16xf32>
    %46 = arith.addf %45, %41 : vector<160x16xf32>
    %cst_32 = arith.constant 0.000000e+00 : f32
    %47 = vector.broadcast %cst_32 : f32 to vector<160x16xf32>
    %48 = arith.maximumf %46, %47 : vector<160x16xf32>
    %49 = arith.truncf %48 : vector<160x16xf32> to vector<160x16xbf16>
    %cst_33 = arith.constant dense<0.000000e+00> : vector<160x16xf32>
    %50 = tpu.matmul %8, %49, %cst_33 {dimension_numbers = #tpu.dot_dimension_numbers<[1], [0], [0], [1], [0, 0, 1, 1], [], []>} : vector<160x160xbf16>, vector<160x16xbf16>, vector<160x16xf32> -> vector<160x16xf32>
    %51 = vector.broadcast %18 : vector<160x1xf32> to vector<160x16xf32>
    %52 = arith.addf %50, %51 : vector<160x16xf32>
    %53 = vector.extract_strided_slice %52 {offsets = [0, 0], sizes = [80, 16], strides = [1, 1]} : vector<160x16xf32> to vector<80x16xf32>
    %54 = vector.extract_strided_slice %52 {offsets = [80, 0], sizes = [80, 16], strides = [1, 1]} : vector<160x16xf32> to vector<80x16xf32>
    %cst_34 = arith.constant 0.000000e+00 : f32
    %55 = vector.broadcast %cst_34 : f32 to vector<80x16xf32>
    %56 = arith.maximumf %53, %55 : vector<80x16xf32>
    %57 = arith.addf %56, %19 : vector<80x16xf32>
    %cst_35 = arith.constant 0.000000e+00 : f32
    %58 = vector.broadcast %cst_35 : f32 to vector<80x16xf32>
    %59 = arith.maximumf %54, %58 : vector<80x16xf32>
    %60 = arith.subf %57, %59 : vector<80x16xf32>
    %c0_36 = arith.constant 0 : index
    %c0_37 = arith.constant 0 : index
    %61 = vector.load %arg6[%c0_36, %c0_37] : memref<80x16xf32, #tpu.memory_space<vmem>>, vector<80x16xf32>
    tpu.vector_store %arg6[%c0_36, %c0_37], %60 {strides = array<i32>} : memref<80x16xf32, #tpu.memory_space<vmem>>, vector<80x16xf32>,
    return
  }
  func.func @transform_0(%arg0: i32, %arg1: i32) -> (i32, i32) {
    %c0_i32 = arith.constant 0 : i32
    return %arg0, %arg1 : i32, i32
  }
  func.func @transform_1(%arg0: i32, %arg1: i32) -> (i32, i32) {
    %c0_i32 = arith.constant 0 : i32
    %c0_i32_0 = arith.constant 0 : i32
    %c0_i32_1 = arith.constant 0 : i32
    return %c0_i32, %c0_i32_0 : i32, i32
  }
  func.func @transform_2(%arg0: i32, %arg1: i32) -> (i32, i32, i32) {
    %c0_i32 = arith.constant 0 : i32
    %c0_i32_0 = arith.constant 0 : i32
    %c0_i32_1 = arith.constant 0 : i32
    %c0_i32_2 = arith.constant 0 : i32
    return %c0_i32, %c0_i32_0, %c0_i32_1 : i32, i32, i32
  }
  func.func @transform_3(%arg0: i32, %arg1: i32) -> (i32, i32, i32) {
    %c0_i32 = arith.constant 0 : i32
    %c0_i32_0 = arith.constant 0 : i32
    %c0_i32_1 = arith.constant 0 : i32
    %c0_i32_2 = arith.constant 0 : i32
    return %c0_i32, %c0_i32_0, %c0_i32_1 : i32, i32, i32
  }
  func.func @transform_4(%arg0: i32, %arg1: i32) -> (i32, i32) {
    %c0_i32 = arith.constant 0 : i32
    return %arg0, %arg1 : i32, i32
  }
}

</mosaic_0001>

<bundles_post_ra>
// kernel: generator_forward.1
= control target key start
LH: loop header
LB: loop body
LE: loop exit
PB: predicated region body
PF: predicated region fallthrough
CT: control target
= control target key end

     0   :  { %s2982_s15 = smov 0   ;;  %s2984_s16 = smov 0   ;;  %s4196_s0 = inlined_call_operand.vmem [shape: f32[160,16], index: 0, kind: input, shape index: {}]   ;;  %s4197_s1 = inlined_call_operand.vmem [shape: bf16[160,80], index: 1, kind: input, shape index: {}]   ;;  %s4198_s2 = inlined_call_operand.vmem [shape: bf16[4,160,160], index: 2, kind: input, shape index: {}]   ;;  %s4199_s3 = inlined_call_operand.vmem [shape: f32[5,160,1], index: 3, kind: input, shape index: {}]   ;;  %s4200_s4 = inlined_call_operand.vmem [shape: f32[160,16], index: 4, kind: output, shape index: {}]  }
   0x1   :  { %s2986_s17 = smov 0  }
   0x2 LB: > { %s26_s18 = sadd.s32 1, %s2950_s16  ;;  %p2415_p0 = scmp.ge.s32.totalorder %s2954_s17, 1  ;;  %s2954_s17 = sphi %s2986_s17, %s14_s17   ;;  %s2950_s16 = sphi %s2984_s16, %s4202_s16   ;;  %s2946_s15 = sphi %s2982_s15, %s4201_s15  }
   0x3   : > { %p28_p1 = scmp.ge.s32.totalorder %s26_s18, 2  ;;  %p182_p2 = scmp.lt.s32.totalorder %s2954_s17, 3 }
   0x5   : > { %s4204_s18 = smov (%p28_p1, %s26_s18), 0  ;;  %p183_p3 = pnand %p2415_p0, %p182_p2 }
   0x6   : > { %v338_v0 = vld [vmem:[%s4199_s3 + $0x10] sm:$0xff] (!%p183_p3)  ;;  %v336_v1 = vld [vmem:[%s4199_s3] sm:$0xff] (!%p183_p3)  ;;  %s214_s23 = smul.u32 (!%p183_p3), 10, %s2946_s15  ;;  %v2956_v2 = vmov (!%p183_p3), 0   ;;  %v339_v3 = vld [vmem:[%s4199_s3 + $0x18] sm:$0xff] (!%p183_p3)  ;;  %vm605_vm0 = vcmask (!%p183_p3), 654336  }
   0x7   : > { %186 = sbr.rel (%p183_p3) target bundleno = 1478 (0x5c6), region = 36  ;;  %2791 = vset.pattern.permute.xlu1 (!%p183_p3), %v2956_v2  ;;  %2790 = vset.pattern.permute.xlu0 (!%p183_p3), %v2956_v2  ;;  %v337_v4 = vld [vmem:[%s4199_s3 + $0x8] sm:$0xff] (!%p183_p3)  ;;  %v2792_v5 = vld [vmem:[%s4197_s1] sm:$0xff] (!%p183_p3)   ;;  %v343_v16 = vld [vmem:[%s4199_s3 + $0x38] sm:$0xff] (!%p183_p3)  ;;  %vm989_vm1 = vcmask (!%p183_p3), 261120   ;;  %vm2322_vm2 = vcmask (!%p183_p3), 130048  }
   0x8   : > { %467 = vperm.xlu1 (!%p183_p3), %2791, %v338_v0   ;;  %457 = vperm.xlu0 (!%p183_p3), %2790, %v336_v1   ;;  %p215_p4 = scmp.lt.s32.totalorder (!%p183_p3), %s214_s23, 19  ;;  %v341_v6 = vld [vmem:[%s4199_s3 + $0x28] sm:$0xff] (!%p183_p3)  ;;  %v340_v7 = vld [vmem:[%s4199_s3 + $0x20] sm:$0xff] (!%p183_p3)  ;;  %v342_v17 = vld [vmem:[%s4199_s3 + $0x30] sm:$0xff] (!%p183_p3) }
   0x9   : > { %1020 = vmatprep.subr.bf16.mxu1 (!%p183_p3), %v2956_v2  ;;  %2725 = vmatprep.mubr.msk.bf16.mxu0 (!%p183_p3), %vm605_vm0, %v2792_v5  ;;  %v345_v19 = vld [vmem:[%s4199_s3 + $0x48] sm:$0xff] (!%p183_p3)  ;;  %v344_v22 = vld [vmem:[%s4199_s3 + $0x40] sm:$0xff] (!%p183_p3)  ;;  %v347_v23 = vld [vmem:[%s4199_s3 + $0x58] sm:$0xff] (!%p183_p3) }
   0xa   : > { %v346_v27 = vld [vmem:[%s4199_s3 + $0x50] sm:$0xff] (!%p183_p3)  ;;  %v349_v29 = vld [vmem:[%s4199_s3 + $0x68] sm:$0xff] (!%p183_p3)  ;;  %v348_v30 = vld [vmem:[%s4199_s3 + $0x60] sm:$0xff] (!%p183_p3) }
   0xb   : > { %v351_v31 = vld [vmem:[%s4199_s3 + $0x78] sm:$0xff] (!%p183_p3)  ;;  %v350_v32 = vld [vmem:[%s4199_s3 + $0x70] sm:$0xff] (!%p183_p3)  ;;  %v2793_v33 = vld [vmem:[%s4197_s1 + $0x8] sm:$0xff] (!%p183_p3)  }
   0xc   : > { %472 = vperm.xlu1 (!%p183_p3), %2791, %v339_v3   ;;  %462 = vperm.xlu0 (!%p183_p3), %2790, %v337_v4   ;;  %v2794_v34 = vld [vmem:[%s4197_s1 + $0x10] sm:$0xff] (!%p183_p3)   ;;  %v353_v35 = vld [vmem:[%s4199_s3 + $0x88] sm:$0xff] (!%p183_p3)  ;;  %v352_v36 = vld [vmem:[%s4199_s3 + $0x80] sm:$0xff] (!%p183_p3) }
   0xd   : > { %v355_v37 = vld [vmem:[%s4199_s3 + $0x98] sm:$0xff] (!%p183_p3)  ;;  %v354_v38 = vld [vmem:[%s4199_s3 + $0x90] sm:$0xff] (!%p183_p3)  ;;  %v2796_v40 = vld [vmem:[%s4197_s1 + $0x20] sm:$0xff] (!%p183_p3)  }
   0xe   : > { %s4206_s23 = smov (!%p215_p4, %s214_s23), 19  ;;  %v2795_v39 = vld [vmem:[%s4197_s1 + $0x18] sm:$0xff]   ;;  %v2479_v41 = vld [vmem:[%s4199_s3 + $0xa8] sm:$0xff]  ;;  %v2478_v42 = vld [vmem:[%s4199_s3 + $0xa0] sm:$0xff] }
   0xf   : > { %s2416_s28 = sshll.u32 %s4206_s23, 3  ;;  %v2481_v43 = vld [vmem:[%s4199_s3 + $0xb8] sm:$0xff]  ;;  %v2480_v44 = vld [vmem:[%s4199_s3 + $0xb0] sm:$0xff]  ;;  %v2797_v45 = vld [vmem:[%s4197_s1 + $0x28] sm:$0xff]  }
  0x10   : > { %s3032_s11 = scalar_lea.vmem %s4196_s0, %s2416_s28  ;;  %482 = vperm.xlu1 %2791, %v341_v6   ;;  %477 = vperm.xlu0 %2790, %v340_v7   ;;  %v2798_v46 = vld [vmem:[%s4197_s1 + $0x30] sm:$0xff]   ;;  %v2483_v47 = vld [vmem:[%s4199_s3 + $0xc8] sm:$0xff]  ;;  %v2482_v48 = vld [vmem:[%s4199_s3 + $0xc0] sm:$0xff]  ;;  %s4140_s24 = scalar_lea.vmem %s4200_s4, %s2416_s28 }
  0x11   : > { %v3035_v8 = vld [vmem:[%s3032_s11] sm:$0xff]  ;;  %v3038_v9 = vld [vmem:[%s3032_s11 + $0x8] sm:$0xff]  ;;  %v3041_v10 = vld [vmem:[%s3032_s11 + $0x10] sm:$0xff] }
  0x12   : > { %v450_v11 = vpack.c.bf16 %v3038_v9, %v3035_v8  ;;  %v3047_v12 = vld [vmem:[%s3032_s11 + $0x18] sm:$0xff]  ;;  %v3052_v14 = vld [vmem:[%s3032_s11 + $0x20] sm:$0xff]  ;;  %v3055_v15 = vld [vmem:[%s3032_s11 + $0x28] sm:$0xff] }
  0x13   : > { %v451_v13 = vpack.c.bf16 %v3047_v12, %v3041_v10  ;;  %v452_v18 = vpack.c.bf16 %v3055_v15, %v3052_v14  ;;  %v3069_v20 = vld [vmem:[%s3032_s11 + $0x30] sm:$0xff]  ;;  %v3072_v21 = vld [vmem:[%s3032_s11 + $0x38] sm:$0xff]  ;;  %v3083_v25 = vld [vmem:[%s3032_s11 + $0x40] sm:$0xff] }
  0x14   : > { %2715 = vmatprep.subr.bf16.mxu0 %v450_v11  ;;  %492 = vperm.xlu1 %2791, %v343_v16   ;;  %v453_v24 = vpack.c.bf16 %v3072_v21, %v3069_v20  ;;  %v3086_v26 = vld [vmem:[%s3032_s11 + $0x48] sm:$0xff]  ;;  %v2485_v49 = vld [vmem:[%s4199_s3 + $0xd8] sm:$0xff]  ;;  %v2484_v50 = vld [vmem:[%s4199_s3 + $0xd0] sm:$0xff] }
  0x15   : > { %2716 = vmatpush3.bf16.msra.mxu0 %v450_v11  ;;  %487 = vperm.xlu0 %2790, %v342_v17   ;;  %v454_v28 = vpack.c.bf16 %v3086_v26, %v3083_v25  ;;  %v2799_v51 = vld [vmem:[%s4197_s1 + $0x38] sm:$0xff]   ;;  %v2800_v52 = vld [vmem:[%s4197_s1 + $0x40] sm:$0xff]   ;;  %v2487_v53 = vld [vmem:[%s4199_s3 + $0xe8] sm:$0xff] }
  0x16   : > { %2717 = vmatprep.subr.bf16.mxu0 %v451_v13  ;;  %v2486_v54 = vld [vmem:[%s4199_s3 + $0xe0] sm:$0xff]  ;;  %v2489_v55 = vld [vmem:[%s4199_s3 + $0xf8] sm:$0xff]  ;;  %v2488_v56 = vld [vmem:[%s4199_s3 + $0xf0] sm:$0xff] }
  0x17   : > { %v2801_v57 = vld [vmem:[%s4197_s1 + $0x48] sm:$0xff]   ;;  %v2490_v59 = vld [vmem:[%s4199_s3 + $0x100] sm:$0xff]  ;;  %v2493_v60 = vld [vmem:[%s4199_s3 + $0x118] sm:$0xff] }
  0x18   : > { %502 = vperm.xlu1 %2791, %v345_v19   ;;  %v2491_v58 = vld [vmem:[%s4199_s3 + $0x108] sm:$0xff]  ;;  %v2492_v61 = vld [vmem:[%s4199_s3 + $0x110] sm:$0xff]  ;;  %v2494_v63 = vld [vmem:[%s4199_s3 + $0x120] sm:$0xff] }
  0x19   : > { %2718 = vmatpush3.bf16.msra.mxu0 %v451_v13  ;;  %497 = vperm.xlu0 %2790, %v344_v22   ;;  %v2495_v62 = vld [vmem:[%s4199_s3 + $0x128] sm:$0xff]  ;;  %v2497_v0 = vld [vmem:[%s4199_s3 + $0x138] sm:$0xff]  ;;  %v2496_v1 = vld [vmem:[%s4199_s3 + $0x130] sm:$0xff] }
  0x1a   : > { %2719 = vmatprep.subr.bf16.mxu0 %v452_v18  ;;  %v2499_v3 = vld [vmem:[%s4199_s3 + $0x148] sm:$0xff]  ;;  %v2498_v4 = vld [vmem:[%s4199_s3 + $0x140] sm:$0xff]  ;;  %v2501_v5 = vld [vmem:[%s4199_s3 + $0x158] sm:$0xff] }
  0x1b   : > { %v2500_v6 = vld [vmem:[%s4199_s3 + $0x150] sm:$0xff]  ;;  %v2503_v7 = vld [vmem:[%s4199_s3 + $0x168] sm:$0xff]  ;;  %v2502_v11 = vld [vmem:[%s4199_s3 + $0x160] sm:$0xff] }
  0x1c   : > { %512 = vperm.xlu1 %2791, %v347_v23   ;;  %v2505_v13 = vld [vmem:[%s4199_s3 + $0x178] sm:$0xff]  ;;  %v2504_v16 = vld [vmem:[%s4199_s3 + $0x170] sm:$0xff]  ;;  %v2507_v17 = vld [vmem:[%s4199_s3 + $0x188] sm:$0xff] }
  0x1d   : > { %2720 = vmatpush3.bf16.msra.mxu0 %v452_v18  ;;  %507 = vperm.xlu0 %2790, %v346_v27   ;;  %v2506_v18 = vld [vmem:[%s4199_s3 + $0x180] sm:$0xff]  ;;  %v2509_v19 = vld [vmem:[%s4199_s3 + $0x198] sm:$0xff]  ;;  %v2508_v22 = vld [vmem:[%s4199_s3 + $0x190] sm:$0xff] }
  0x1e   : > { %2721 = vmatprep.subr.bf16.mxu0 %v453_v24  ;;  %v2511_v23 = vld [vmem:[%s4199_s3 + $0x1a8] sm:$0xff]  ;;  %v2513_v27 = vld [vmem:[%s4199_s3 + $0x1b8] sm:$0xff] }
  0x20   : > { %522 = vperm.xlu1 %2791, %v349_v29   ;;  %v2515_v29 = vld [vmem:[%s4199_s3 + $0x1c8] sm:$0xff] }
  0x21   : > { %2722 = vmatpush3.bf16.msra.mxu0 %v453_v24  ;;  %517 = vperm.xlu0 %2790, %v348_v30   ;;  %v2510_v24 = vld [vmem:[%s4199_s3 + $0x1a0] sm:$0xff] }
  0x22   : > { %2723 = vmatprep.subr.bf16.mxu0 %v454_v28  ;;  %v2514_v30 = vld [vmem:[%s4199_s3 + $0x1c0] sm:$0xff] }
  0x24   : > { %532 = vperm.xlu1 %2791, %v351_v31   ;;  %v2517_v31 = vld [vmem:[%s4199_s3 + $0x1d8] sm:$0xff] }
  0x25   : > { %2724 = vmatpush3.bf16.msra.mxu0 %v454_v28  ;;  %527 = vperm.xlu0 %2790, %v350_v32   ;;  %v2512_v28 = vld [vmem:[%s4199_s3 + $0x1b0] sm:$0xff] }
  0x26   : > { %1403 = vmatprep.subr.bf16.mxu0 %v2956_v2  ;;  %v2516_v32 = vld [vmem:[%s4199_s3 + $0x1d0] sm:$0xff] }
  0x28   : > { %2726 = vmatmul.mubr.msk.bf16.vlgmr.msra.gmra.mrb[0].mxu0 %vm605_vm0, %v2793_v33  ;;  %542 = vperm.xlu1 %2791, %v353_v35   ;;  %v2519_v33 = vld [vmem:[%s4199_s3 + $0x1e8] sm:$0xff]  ;;  %v2521_v35 = vld [vmem:[%s4199_s3 + $0x1f8] sm:$0xff] }
  0x29   : > { %2729 = vmatprep.mubr.msk.bf16.mxu0 %vm605_vm0, %v2794_v34  ;;  %537 = vperm.xlu0 %2790, %v352_v36   ;;  %v2518_v34 = vld [vmem:[%s4199_s3 + $0x1e0] sm:$0xff]  ;;  %v2520_v36 = vld [vmem:[%s4199_s3 + $0x1f0] sm:$0xff] }
  0x2c   : > { %552 = vperm.xlu1 %2791, %v355_v37   ;;  %v2523_v37 = vld [vmem:[%s4199_s3 + $0x208] sm:$0xff] }
  0x2d   : > { %547 = vperm.xlu0 %2790, %v354_v38   ;;  %v2522_v38 = vld [vmem:[%s4199_s3 + $0x200] sm:$0xff] }
  0x30   : > { %2730 = vmatmul.mubr.msk.bf16.gmra.mrb[4].mxu0 %vm605_vm0, %v2795_v39  ;;  %806 = vperm.xlu1 %2791, %v2479_v41   ;;  %v2525_v39 = vld [vmem:[%s4199_s3 + $0x218] sm:$0xff]  ;;  %v2527_v41 = vld [vmem:[%s4199_s3 + $0x228] sm:$0xff] }
  0x31   : > { %2733 = vmatprep.mubr.msk.bf16.mxu0 %vm605_vm0, %v2796_v40  ;;  %801 = vperm.xlu0 %2790, %v2478_v42   ;;  %v2524_v40 = vld [vmem:[%s4199_s3 + $0x210] sm:$0xff]  ;;  %v2526_v42 = vld [vmem:[%s4199_s3 + $0x220] sm:$0xff] }
  0x34   : > { %816 = vperm.xlu1 %2791, %v2481_v43   ;;  %v2529_v43 = vld [vmem:[%s4199_s3 + $0x238] sm:$0xff] }
  0x35   : > { %811 = vperm.xlu0 %2790, %v2480_v44   ;;  %v2528_v44 = vld [vmem:[%s4199_s3 + $0x230] sm:$0xff] }
  0x38   : > { %2734 = vmatmul.mubr.msk.bf16.gmra.mrb[8].mxu0 %vm605_vm0, %v2797_v45  ;;  %826 = vperm.xlu1 %2791, %v2483_v47   ;;  %v2531_v45 = vld [vmem:[%s4199_s3 + $0x248] sm:$0xff]  ;;  %v2533_v47 = vld [vmem:[%s4199_s3 + $0x258] sm:$0xff] }
  0x39   : > { %2737 = vmatprep.mubr.msk.bf16.mxu0 %vm605_vm0, %v2798_v46  ;;  %821 = vperm.xlu0 %2790, %v2482_v48   ;;  %v2530_v46 = vld [vmem:[%s4199_s3 + $0x240] sm:$0xff]  ;;  %v2532_v48 = vld [vmem:[%s4199_s3 + $0x250] sm:$0xff] }
  0x3c   : > { %836 = vperm.xlu1 %2791, %v2485_v49   ;;  %v2535_v49 = vld [vmem:[%s4199_s3 + $0x268] sm:$0xff] }
  0x3d   : > { %831 = vperm.xlu0 %2790, %v2484_v50   ;;  %v2534_v50 = vld [vmem:[%s4199_s3 + $0x260] sm:$0xff] }
  0x40   : > { %2738 = vmatmul.mubr.msk.bf16.gmra.mrb[12].mxu0 %vm605_vm0, %v2799_v51  ;;  %846 = vperm.xlu1 %2791, %v2487_v53   ;;  %v2537_v51 = vld [vmem:[%s4199_s3 + $0x278] sm:$0xff]  ;;  %v2539_v53 = vld [vmem:[%s4199_s3 + $0x288] sm:$0xff] }
  0x41   : > { %2741 = vmatprep.mubr.msk.bf16.mxu0 %vm605_vm0, %v2800_v52  ;;  %841 = vperm.xlu0 %2790, %v2486_v54   ;;  %v2536_v52 = vld [vmem:[%s4199_s3 + $0x270] sm:$0xff]  ;;  %v2538_v54 = vld [vmem:[%s4199_s3 + $0x280] sm:$0xff] }
  0x44   : > { %856 = vperm.xlu1 %2791, %v2489_v55   ;;  %v2541_v55 = vld [vmem:[%s4199_s3 + $0x298] sm:$0xff] }
  0x45   : > { %851 = vperm.xlu0 %2790, %v2488_v56   ;;  %v2540_v56 = vld [vmem:[%s4199_s3 + $0x290] sm:$0xff] }
  0x48   : > { %2742 = vmatmul.mubr.msk.bf16.gmra.mrb[16].mxu0 %vm605_vm0, %v2801_v57  ;;  %866 = vperm.xlu1 %2791, %v2491_v58   ;;  %v2804_v57 = vld [vmem:[%s4198_s2 + $0x4] ss:$8 sps:$4 sm:$0xff]  }
  0x49   : > { %861 = vperm.xlu0 %2790, %v2490_v59   ;;  %2598 = vmatprep.mubr.msk.bf16.mxu1 %vm989_vm1, %v2804_v57  ;;  %v2543_v58 = vld [vmem:[%s4199_s3 + $0x2a8] sm:$0xff]  ;;  %v2542_v59 = vld [vmem:[%s4199_s3 + $0x2a0] sm:$0xff] }
  0x4c   : > { %876 = vperm.xlu1 %2791, %v2493_v60   ;;  %v2545_v60 = vld [vmem:[%s4199_s3 + $0x2b8] sm:$0xff] }
  0x4d   : > { %871 = vperm.xlu0 %2790, %v2492_v61   ;;  %v2544_v61 = vld [vmem:[%s4199_s3 + $0x2b0] sm:$0xff] }
  0x50   : > { %886 = vperm.xlu1 %2791, %v2495_v62   ;;  %v2547_v62 = vld [vmem:[%s4199_s3 + $0x2c8] sm:$0xff] }
  0x51   : > { %881 = vperm.xlu0 %2790, %v2494_v63   ;;  %v2546_v63 = vld [vmem:[%s4199_s3 + $0x2c0] sm:$0xff] }
  0x54   : > { %896 = vperm.xlu1 %2791, %v2497_v0   ;;  %v2549_v0 = vld [vmem:[%s4199_s3 + $0x2d8] sm:$0xff] }
  0x55   : > { %891 = vperm.xlu0 %2790, %v2496_v1   ;;  %v2548_v1 = vld [vmem:[%s4199_s3 + $0x2d0] sm:$0xff] }
  0x58   : > { %1190 = vperm.xlu1 %2791, %v2499_v3   ;;  %v2551_v3 = vld [vmem:[%s4199_s3 + $0x2e8] sm:$0xff] }
  0x59   : > { %1185 = vperm.xlu0 %2790, %v2498_v4   ;;  %v2550_v4 = vld [vmem:[%s4199_s3 + $0x2e0] sm:$0xff] }
  0x5c   : > { %1200 = vperm.xlu1 %2791, %v2501_v5   ;;  %v2553_v5 = vld [vmem:[%s4199_s3 + $0x2f8] sm:$0xff] }
  0x5d   : > { %1195 = vperm.xlu0 %2790, %v2500_v6   ;;  %v2552_v6 = vld [vmem:[%s4199_s3 + $0x2f0] sm:$0xff] }
  0x60   : > { %1210 = vperm.xlu1 %2791, %v2503_v7   ;;  %v2555_v7 = vld [vmem:[%s4199_s3 + $0x308] sm:$0xff] }
  0x61   : > { %1205 = vperm.xlu0 %2790, %v2502_v11   ;;  %v2554_v11 = vld [vmem:[%s4199_s3 + $0x300] sm:$0xff] }
  0x64   : > { %1220 = vperm.xlu1 %2791, %v2505_v13   ;;  %v2557_v13 = vld [vmem:[%s4199_s3 + $0x318] sm:$0xff] }
  0x65   : > { %1215 = vperm.xlu0 %2790, %v2504_v16   ;;  %v2556_v16 = vld [vmem:[%s4199_s3 + $0x310] sm:$0xff] }
  0x68   : > { %1230 = vperm.xlu1 %2791, %v2507_v17  }
  0x69   : > { %1225 = vperm.xlu0 %2790, %v2506_v18  }
  0x6c   : > { %1240 = vperm.xlu1 %2791, %v2509_v19  }
  0x6d   : > { %1235 = vperm.xlu0 %2790, %v2508_v22  }
  0x70   : > { %1250 = vperm.xlu1 %2791, %v2511_v23  }
  0x71   : > { %1245 = vperm.xlu0 %2790, %v2510_v24  }
  0x74   : > { %1260 = vperm.xlu1 %2791, %v2513_v27  }
  0x75   : > { %1255 = vperm.xlu0 %2790, %v2512_v28  }
  0x78   : > { %1270 = vperm.xlu1 %2791, %v2515_v29  }
  0x79   : > { %1265 = vperm.xlu0 %2790, %v2514_v30  }
  0x7c   : > { %1280 = vperm.xlu1 %2791, %v2517_v31  }
  0x7d   : > { %1275 = vperm.xlu0 %2790, %v2516_v32  }
  0x80   : > { %1573 = vperm.xlu1 %2791, %v2519_v33  }
  0x81   : > { %1568 = vperm.xlu0 %2790, %v2518_v34  }
  0x84   : > { %1583 = vperm.xlu1 %2791, %v2521_v35  }
  0x85   : > { %1578 = vperm.xlu0 %2790, %v2520_v36  }
  0x87   : > { %v468_v17 = vpop.permute.xlu1 %467  ;;  %v458_v18 = vpop.permute.xlu0 %457 }
  0x88   : > { %1593 = vperm.xlu1 %2791, %v2523_v37  }
  0x89   : > { %1588 = vperm.xlu0 %2790, %v2522_v38  }
  0x8b   : > { %v473_v19 = vpop.permute.xlu1 %472  ;;  %v463_v22 = vpop.permute.xlu0 %462 }
  0x8c   : > { %1603 = vperm.xlu1 %2791, %v2525_v39  }
  0x8d   : > { %1598 = vperm.xlu0 %2790, %v2524_v40  }
  0x8f   : > { %v483_v23 = vpop.permute.xlu1 %482  ;;  %v478_v24 = vpop.permute.xlu0 %477 }
  0x90   : > { %1613 = vperm.xlu1 %2791, %v2527_v41  }
  0x91   : > { %1608 = vperm.xlu0 %2790, %v2526_v42  }
  0x93   : > { %v493_v27 = vpop.permute.xlu1 %492 }
  0x94   : > { %1623 = vperm.xlu1 %2791, %v2529_v43   ;;  %v488_v28 = vpop.permute.xlu0 %487 }
  0x95   : > { %1618 = vperm.xlu0 %2790, %v2528_v44  }
  0x97   : > { %v503_v34 = vpop.permute.xlu1 %502 }
  0x98   : > { %1633 = vperm.xlu1 %2791, %v2531_v45   ;;  %v498_v39 = vpop.permute.xlu0 %497 }
  0x99   : > { %1628 = vperm.xlu0 %2790, %v2530_v46  }
  0x9c   : > { %1643 = vperm.xlu1 %2791, %v2533_v47   ;;  %v513_v47 = vpop.permute.xlu1 %512 }
  0x9d   : > { %1638 = vperm.xlu0 %2790, %v2532_v48  }
  0xa0   : > { %1653 = vperm.xlu1 %2791, %v2535_v49  }
  0xa1   : > { %1648 = vperm.xlu0 %2790, %v2534_v50  }
  0xa4   : > { %1663 = vperm.xlu1 %2791, %v2537_v51  }
  0xa5   : > { %1658 = vperm.xlu0 %2790, %v2536_v52  }
  0xa8   : > { %1956 = vperm.xlu1 %2791, %v2539_v53   ;;  %v508_v53 = vpop.permute.xlu0 %507 }
  0xa9   : > { %1951 = vperm.xlu0 %2790, %v2538_v54  }
  0xac   : > { %1966 = vperm.xlu1 %2791, %v2541_v55  }
  0xad   : > { %1961 = vperm.xlu0 %2790, %v2540_v56  }
  0xb0   : > { %1976 = vperm.xlu1 %2791, %v2543_v58  }
  0xb1   : > { %1971 = vperm.xlu0 %2790, %v2542_v59  }
  0xb4   : > { %1986 = vperm.xlu1 %2791, %v2545_v60  }
  0xb5   : > { %1981 = vperm.xlu0 %2790, %v2544_v61  }
  0xb8   : > { %1996 = vperm.xlu1 %2791, %v2547_v62   ;;  %v523_v62 = vpop.permute.xlu1 %522 }
  0xb9   : > { %1991 = vperm.xlu0 %2790, %v2546_v63  }
  0xbc   : > { %2006 = vperm.xlu1 %2791, %v2549_v0  }
  0xbd   : > { %2001 = vperm.xlu0 %2790, %v2548_v1  }
  0xc0   : > { %2016 = vperm.xlu1 %2791, %v2551_v3  }
  0xc1   : > { %2011 = vperm.xlu0 %2790, %v2550_v4  }
  0xc4   : > { %2026 = vperm.xlu1 %2791, %v2553_v5   ;;  %v518_v5 = vpop.permute.xlu0 %517 }
  0xc5   : > { %2021 = vperm.xlu0 %2790, %v2552_v6  }
  0xc8   : > { %2036 = vperm.xlu1 %2791, %v2555_v7  }
  0xc9   : > { %2031 = vperm.xlu0 %2790, %v2554_v11  }
  0xcc   : > { %2046 = vperm.xlu1 %2791, %v2557_v13  }
  0xcd   : > { %2041 = vperm.xlu0 %2790, %v2556_v16  }
  0xfb   : > { %v2727_v29 = vpop.f32.mrb[0].mxu0 }
  0xfc   : > { %v670_v30 = vpop.f32.mrb[1].mxu0  ;;  %v679_v36 = vadd.f32 %v2727_v29, %v468_v17 }
  0xfd   : > { %v671_v31 = vadd.f32 %v670_v30, %v458_v18  ;;  %v2728_v32 = vpop.f32.mrb[2].mxu0  ;;  %v528_v30 = vpop.permute.xlu0 %527 }
  0xfe   : > { %v682_v33 = vadd.f32 %v2728_v32, %v473_v19  ;;  %v673_v35 = vpop.f32.mrb[3].mxu0  ;;  %v751_v43 = vmax.f32 %v679_v36, 0.0 }
  0xff   : > { %v749_v37 = vmax.f32 %v671_v31, 0.0  ;;  %v674_v38 = vadd.f32 %v673_v35, %v463_v22 }
 0x100   : > { %v752_v40 = vmax.f32 %v682_v33, 0.0  ;;  %v3410_v55 = vadd.f32 %v751_v43, %v3041_v10 }
 0x101   : > { %v750_v41 = vmax.f32 %v674_v38, 0.0  ;;  %v3399_v44 = vadd.f32 %v749_v37, %v3035_v8 }
 0x102   : > { %v3405_v50 = vadd.f32 %v752_v40, %v3047_v12 }
 0x103   : > { %v2731_v42 = vpop.f32.mrb[4].mxu0  ;;  %v3402_v45 = vadd.f32 %v750_v41, %v3038_v9 }
 0x104   : > { %v686_v46 = vpop.f32.mrb[5].mxu0  ;;  %v695_v56 = vadd.f32 %v2731_v42, %v488_v28  ;;  %v790_v61 = vpack.c.bf16 %v3405_v50, %v3410_v55 }
 0x105   : > { %v687_v48 = vadd.f32 %v686_v46, %v478_v24  ;;  %v2732_v49 = vpop.f32.mrb[6].mxu0  ;;  %v789_v52 = vpack.c.bf16 %v3402_v45, %v3399_v44  ;;  %v533_v24 = vpop.permute.xlu1 %532 }
 0x106   : > { %v698_v51 = vadd.f32 %v2732_v49, %v493_v27  ;;  %v689_v54 = vpop.f32.mrb[7].mxu0  ;;  %v755_v0 = vmax.f32 %v695_v56, 0.0  ;;  %v538_v49 = vpop.permute.xlu0 %537 }
 0x107   : > { %v753_v57 = vmax.f32 %v687_v48, 0.0  ;;  %v690_v58 = vadd.f32 %v689_v54, %v483_v23  ;;  %1021 = vmatpush1.bf16.msra.mxu1 %v789_v52 }
 0x108   : > { %1022 = vmatprep.subr.bf16.mxu1 %v2956_v2  ;;  %v756_v59 = vmax.f32 %v698_v51, 0.0  ;;  %v3428_v18 = vadd.f32 %v755_v0, %v3069_v20 }
 0x109   : > { %v754_v60 = vmax.f32 %v690_v58, 0.0  ;;  %v3416_v1 = vadd.f32 %v753_v57, %v3052_v14  ;;  %v543_v41 = vpop.permute.xlu1 %542 }
 0x10a   : > { %v3423_v11 = vadd.f32 %v756_v59, %v3072_v21  ;;  %v548_v0 = vpop.permute.xlu0 %547 }
 0x10b   : > { %v2735_v63 = vpop.f32.mrb[8].mxu0  ;;  %v3419_v3 = vadd.f32 %v754_v60, %v3055_v15  ;;  %1023 = vmatpush1.bf16.msra.mxu1 %v790_v61 }
 0x10c   : > { %v702_v4 = vpop.f32.mrb[9].mxu0  ;;  %1024 = vmatprep.subr.bf16.mxu1 %v2956_v2  ;;  %v711_v19 = vadd.f32 %v2735_v63, %v508_v53  ;;  %v792_v29 = vpack.c.bf16 %v3423_v11, %v3428_v18 }
 0x10d   : > { %v703_v6 = vadd.f32 %v702_v4, %v498_v39  ;;  %v2736_v7 = vpop.f32.mrb[10].mxu0  ;;  %v791_v16 = vpack.c.bf16 %v3419_v3, %v3416_v1  ;;  %v553_v58 = vpop.permute.xlu1 %552 }
 0x10e   : > { %v714_v13 = vadd.f32 %v2736_v7, %v513_v47  ;;  %v705_v17 = vpop.f32.mrb[11].mxu0  ;;  %v759_v32 = vmax.f32 %v711_v19, 0.0 }
 0x10f   : > { %v757_v22 = vmax.f32 %v703_v6, 0.0  ;;  %v706_v23 = vadd.f32 %v705_v17, %v503_v34  ;;  %1025 = vmatpush1.bf16.msra.mxu1 %v791_v16 }
 0x110   : > { %1026 = vmatprep.subr.bf16.mxu1 %v2956_v2  ;;  %v760_v27 = vmax.f32 %v714_v13, 0.0  ;;  %v3446_v43 = vadd.f32 %v759_v32, %v3035_v8  ;;  %v2817_v32 = vld [vmem:[%s4198_s2 + $0x54] ss:$8 sps:$4 sm:$0xff]  }
 0x111   : > { %v758_v28 = vmax.f32 %v706_v23, 0.0  ;;  %v3434_v33 = vadd.f32 %v757_v22, %v3083_v25 }
 0x112   : > { %v3441_v38 = vadd.f32 %v760_v27, %v3038_v9  ;;  %v2810_v27 = vld [vmem:[%s4198_s2 + $0x20] ss:$8 sps:$4 sm:$0xff]  }
 0x113   : > { %v2739_v31 = vpop.f32.mrb[12].mxu0  ;;  %v3437_v35 = vadd.f32 %v758_v28, %v3086_v26  ;;  %1027 = vmatpush1.bf16.msra.mxu1 %v792_v29  ;;  %v2811_v28 = vld [vmem:[%s4198_s2 + $0x34] ss:$8 sps:$4 sm:$0xff]   ;;  %v2813_v29 = vld [vmem:[%s4198_s2 + $0x30] ss:$8 sps:$4 sm:$0xff]  }
 0x114   : > { %v718_v34 = vpop.f32.mrb[13].mxu0  ;;  %1028 = vmatprep.subr.bf16.mxu1 %v2956_v2  ;;  %v727_v46 = vadd.f32 %v2739_v31, %v528_v30  ;;  %v794_v9 = vpack.c.bf16 %v3441_v38, %v3446_v43  ;;  %v2814_v30 = vld [vmem:[%s4198_s2 + $0x44] ss:$8 sps:$4 sm:$0xff]   ;;  %v2816_v31 = vld [vmem:[%s4198_s2 + $0x40] ss:$8 sps:$4 sm:$0xff]  }
 0x115   : > { %v719_v36 = vadd.f32 %v718_v34, %v518_v5  ;;  %v2740_v37 = vpop.f32.mrb[14].mxu0  ;;  %v793_v40 = vpack.c.bf16 %v3437_v35, %v3434_v33  ;;  %v2819_v34 = vld [vmem:[%s4198_s2 + $0x50] ss:$8 sps:$4 sm:$0xff]  }
 0x116   : > { %v730_v39 = vadd.f32 %v2740_v37, %v533_v24  ;;  %v721_v42 = vpop.f32.mrb[15].mxu0  ;;  %v763_v54 = vmax.f32 %v727_v46, 0.0  ;;  %v2808_v24 = vld [vmem:[%s4198_s2 + $0x24] ss:$8 sps:$4 sm:$0xff]   ;;  %v2822_v37 = vld [vmem:[%s4198_s2 + $0x60] ss:$8 sps:$4 sm:$0xff]  }
 0x117   : > { %v761_v47 = vmax.f32 %v719_v36, 0.0  ;;  %v722_v48 = vadd.f32 %v721_v42, %v523_v62  ;;  %1029 = vmatpush1.bf16.msra.mxu1 %v793_v40  ;;  %v2820_v36 = vld [vmem:[%s4198_s2 + $0x64] ss:$8 sps:$4 sm:$0xff]   ;;  %v2825_v40 = vld [vmem:[%s4198_s2 + $0x70] ss:$8 sps:$4 sm:$0xff]  }
 0x118   : > { %1030 = vmatprep.subr.bf16.mxu1 %v2956_v2  ;;  %v764_v51 = vmax.f32 %v730_v39, 0.0  ;;  %v3464_v4 = vadd.f32 %v763_v54, %v3052_v14  ;;  %v2823_v39 = vld [vmem:[%s4198_s2 + $0x74] ss:$8 sps:$4 sm:$0xff]   ;;  %v2828_v42 = vld [vmem:[%s4198_s2 + $0x80] ss:$8 sps:$4 sm:$0xff]  }
 0x119   : > { %v762_v52 = vmax.f32 %v722_v48, 0.0  ;;  %v3452_v56 = vadd.f32 %v761_v47, %v3041_v10  ;;  %v2829_v46 = vld [vmem:[%s4198_s2 + $0x94] ss:$8 sps:$4 sm:$0xff]   ;;  %v2831_v47 = vld [vmem:[%s4198_s2 + $0x90] ss:$8 sps:$4 sm:$0xff]  }
 0x11a   : > { %v3459_v61 = vadd.f32 %v764_v51, %v3055_v15  ;;  %v2834_v48 = vld [vmem:[%s4198_s2 + $0xa4] ss:$8 sps:$4 sm:$0xff]  }
 0x11b   : > { %v2743_v53 = vpop.f32.mrb[16].mxu0  ;;  %v3455_v8 = vadd.f32 %v762_v52, %v3047_v12  ;;  %1031 = vmatpush1.bf16.msra.mxu1 %v794_v9  ;;  %2628 = vmatprep.mubr.msk.bf16.mxu0 %vm989_vm1, %v2834_v48 }
 0x11c   : > { %v734_v57 = vpop.f32.mrb[17].mxu0  ;;  %1032 = vmatprep.subr.bf16.mxu1 %v2956_v2  ;;  %v743_v12 = vadd.f32 %v2743_v53, %v548_v0  ;;  %v796_v15 = vpack.c.bf16 %v3459_v61, %v3464_v4  ;;  %v807_v53 = vpop.permute.xlu1 %806 }
 0x11d   : > { %v735_v59 = vadd.f32 %v734_v57, %v538_v49  ;;  %v2744_v60 = vpop.f32.mrb[18].mxu0  ;;  %v795_v63 = vpack.c.bf16 %v3455_v8, %v3452_v56  ;;  %v802_v49 = vpop.permute.xlu0 %801 }
 0x11e   : > { %v746_v62 = vadd.f32 %v2744_v60, %v553_v58  ;;  %v737_v10 = vpop.f32.mrb[19].mxu0  ;;  %v767_v16 = vmax.f32 %v743_v12, 0.0 }
 0x11f   : > { %v765_v5 = vmax.f32 %v735_v59, 0.0  ;;  %v738_v6 = vadd.f32 %v737_v10, %v543_v41  ;;  %1033 = vmatpush1.bf16.msra.mxu1 %v795_v63  ;;  %v2826_v41 = vld [vmem:[%s4198_s2 + $0x84] ss:$8 sps:$4 sm:$0xff]  }
 0x120   : > { %1034 = vmatprep.subr.bf16.mxu1 %v2956_v2  ;;  %v768_v7 = vmax.f32 %v746_v62, 0.0  ;;  %v3482_v23 = vadd.f32 %v767_v16, %v3083_v25  ;;  %v2807_v25 = vld [vmem:[%s4198_s2 + $0x10] ss:$8 sps:$4 sm:$0xff]  }
 0x121   : > { %v766_v13 = vmax.f32 %v738_v6, 0.0  ;;  %v3470_v17 = vadd.f32 %v765_v5, %v3069_v20  ;;  %v812_v0 = vpop.permute.xlu0 %811 }
 0x122   : > { %v3477_v14 = vadd.f32 %v768_v7, %v3086_v26  ;;  %v2805_v26 = vld [vmem:[%s4198_s2 + $0x14] ss:$8 sps:$4 sm:$0xff]  }
 0x123   : > { %v3473_v19 = vadd.f32 %v766_v13, %v3072_v21  ;;  %1035 = vmatpush1.bf16.msra.mxu1 %v796_v15  ;;  %v2802_v21 = vld [vmem:[%s4198_s2] ss:$8 sps:$4 sm:$0xff]  }
 0x124   : > { %1036 = vmatprep.subr.bf16.mxu1 %v2956_v2  ;;  %v798_v20 = vpack.c.bf16 %v3477_v14, %v3482_v23 }
 0x125   : > { %v797_v22 = vpack.c.bf16 %v3473_v19, %v3470_v17 }
 0x127   : > { %1037 = vmatpush1.bf16.msra.mxu1 %v797_v22 }
 0x128   : > { %1038 = vmatprep.subr.bf16.mxu1 %v2956_v2 }
 0x12b   : > { %1039 = vmatpush1.bf16.msra.mxu1 %v798_v20 }
 0x12c   : > { %1786 = vmatprep.subr.bf16.mxu1 %v2956_v2 }
 0x12e   : > { %1053 = vmatmul.mubr.bf16.vlgmr.msra.gmra.mrb[0].mxu1 %v2802_v21  ;;  %v822_v21 = vpop.permute.xlu0 %821 }
 0x12f   : > { %2599 = vmatprep.mubr.msk.bf16.mxu1 %vm989_vm1, %v2805_v26 }
 0x136   : > { %1061 = vmatmul.mubr.bf16.gmra.mrb[4].mxu1 %v2807_v25 }
 0x137   : > { %2600 = vmatprep.mubr.msk.bf16.mxu1 %vm989_vm1, %v2808_v24 }
 0x13e   : > { %1069 = vmatmul.mubr.bf16.gmra.mrb[8].mxu1 %v2810_v27 }
 0x13f   : > { %2601 = vmatprep.mubr.msk.bf16.mxu1 %vm989_vm1, %v2811_v28 }
 0x146   : > { %1077 = vmatmul.mubr.bf16.gmra.mrb[12].mxu1 %v2813_v29 }
 0x147   : > { %2602 = vmatprep.mubr.msk.bf16.mxu1 %vm989_vm1, %v2814_v30 }
 0x14e   : > { %1085 = vmatmul.mubr.bf16.gmra.mrb[16].mxu1 %v2816_v31 }
 0x14f   : > { %2603 = vmatprep.mubr.msk.bf16.mxu1 %vm989_vm1, %v2817_v32 }
 0x156   : > { %1093 = vmatmul.mubr.bf16.gmra.mrb[20].mxu1 %v2819_v34 }
 0x157   : > { %2604 = vmatprep.mubr.msk.bf16.mxu1 %vm989_vm1, %v2820_v36  ;;  %v832_v36 = vpop.permute.xlu0 %831 }
 0x15e   : > { %1101 = vmatmul.mubr.bf16.gmra.mrb[24].mxu1 %v2822_v37 }
 0x15f   : > { %2605 = vmatprep.mubr.msk.bf16.mxu1 %vm989_vm1, %v2823_v39 }
 0x166   : > { %1109 = vmatmul.mubr.bf16.gmra.mrb[28].mxu1 %v2825_v40 }
 0x167   : > { %2606 = vmatprep.mubr.msk.bf16.mxu1 %vm989_vm1, %v2826_v41 }
 0x16e   : > { %1117 = vmatmul.mubr.bf16.gmra.mrb[32].mxu1 %v2828_v42 }
 0x16f   : > { %2607 = vmatprep.mubr.msk.bf16.mxu1 %vm989_vm1, %v2829_v46 }
 0x176   : > { %1125 = vmatmul.mubr.bf16.gmra.mrb[36].mxu1 %v2831_v47 }
 0x201   : > { %v1054_v51 = vpop.f32.mrb[0].mxu1 }
 0x202   : > { %v1055_v52 = vadd.f32 %v1054_v51, %v802_v49  ;;  %v1056_v9 = vpop.f32.mrb[1].mxu1 }
 0x203   : > { %v1057_v54 = vpop.f32.mrb[2].mxu1 }
 0x204   : > { %v3559_v57 = vadd.f32 %v1055_v52, %v3399_v44  ;;  %v1058_v58 = vadd.f32 %v1057_v54, %v807_v53  ;;  %v1059_v59 = vpop.f32.mrb[3].mxu1  ;;  %v817_v44 = vpop.permute.xlu1 %816 }
 0x205   : > { %v842_v52 = vpop.permute.xlu0 %841 }
 0x206   : > { %v3562_v60 = vadd.f32 %v1058_v58, %v3402_v45  ;;  %v1153_v62 = vmax.f32 %v3559_v57, 0.0 }
 0x208   : > { %v1154_v63 = vmax.f32 %v3562_v60, 0.0  ;;  %v827_v27 = vpop.permute.xlu1 %826 }
 0x209   : > { %v1062_v10 = vpop.f32.mrb[4].mxu1 }
 0x20a   : > { %v1173_v12 = vpack.c.bf16 %v1154_v63, %v1153_v62  ;;  %v1063_v5 = vadd.f32 %v1062_v10, %v812_v0  ;;  %v1064_v6 = vpop.f32.mrb[5].mxu1 }
 0x20b   : > { %v1065_v7 = vpop.f32.mrb[6].mxu1 }
 0x20c   : > { %v3571_v13 = vadd.f32 %v1063_v5, %v3410_v55  ;;  %v1066_v45 = vadd.f32 %v1065_v7, %v817_v44  ;;  %v1067_v15 = vpop.f32.mrb[7].mxu1  ;;  %1404 = vmatpush1.bf16.msra.mxu0 %v1173_v12  ;;  %v837_v41 = vpop.permute.xlu1 %836 }
 0x20d   : > { %1405 = vmatprep.subr.bf16.mxu0 %v2956_v2  ;;  %v852_v44 = vpop.permute.xlu0 %851 }
 0x20e   : > { %v3575_v16 = vadd.f32 %v1066_v45, %v3405_v50  ;;  %v1155_v22 = vmax.f32 %v3571_v13, 0.0 }
 0x210   : > { %v1156_v20 = vmax.f32 %v3575_v16, 0.0  ;;  %v847_v58 = vpop.permute.xlu1 %846 }
 0x211   : > { %v1070_v26 = vpop.f32.mrb[8].mxu1 }
 0x212   : > { %v1174_v55 = vpack.c.bf16 %v1156_v20, %v1155_v22  ;;  %v1071_v25 = vadd.f32 %v1070_v26, %v822_v21  ;;  %v1072_v24 = vpop.f32.mrb[9].mxu1 }
 0x213   : > { %v1073_v28 = vpop.f32.mrb[10].mxu1 }
 0x214   : > { %v3584_v29 = vadd.f32 %v1071_v25, %v3416_v1  ;;  %v1074_v50 = vadd.f32 %v1073_v28, %v827_v27  ;;  %v1075_v30 = vpop.f32.mrb[11].mxu1  ;;  %1406 = vmatpush1.bf16.msra.mxu0 %v1174_v55  ;;  %v857_v21 = vpop.permute.xlu1 %856 }
 0x215   : > { %1407 = vmatprep.subr.bf16.mxu0 %v2956_v2 }
 0x216   : > { %v3588_v31 = vadd.f32 %v1074_v50, %v3419_v3  ;;  %v1157_v32 = vmax.f32 %v3584_v29, 0.0  ;;  %v862_v50 = vpop.permute.xlu0 %861 }
 0x218   : > { %v1158_v34 = vmax.f32 %v3588_v31, 0.0 }
 0x219   : > { %v1078_v37 = vpop.f32.mrb[12].mxu1 }
 0x21a   : > { %v1175_v1 = vpack.c.bf16 %v1158_v34, %v1157_v32  ;;  %v1079_v39 = vadd.f32 %v1078_v37, %v832_v36  ;;  %v1080_v40 = vpop.f32.mrb[13].mxu1 }
 0x21b   : > { %v1081_v42 = vpop.f32.mrb[14].mxu1 }
 0x21c   : > { %v3597_v46 = vadd.f32 %v1079_v39, %v3428_v18  ;;  %v1082_v3 = vadd.f32 %v1081_v42, %v837_v41  ;;  %v1083_v47 = vpop.f32.mrb[15].mxu1  ;;  %1408 = vmatpush1.bf16.msra.mxu0 %v1175_v1  ;;  %v867_v1 = vpop.permute.xlu1 %866 }
 0x21d   : > { %1409 = vmatprep.subr.bf16.mxu0 %v2956_v2 }
 0x21e   : > { %v3601_v48 = vadd.f32 %v1082_v3, %v3423_v11  ;;  %v1159_v49 = vmax.f32 %v3597_v46, 0.0 }
 0x220   : > { %v1160_v51 = vmax.f32 %v3601_v48, 0.0 }
 0x221   : > { %v1086_v9 = vpop.f32.mrb[16].mxu1 }
 0x222   : > { %v1176_v18 = vpack.c.bf16 %v1160_v51, %v1159_v49  ;;  %v1087_v53 = vadd.f32 %v1086_v9, %v842_v52  ;;  %v1088_v54 = vpop.f32.mrb[17].mxu1  ;;  %v872_v52 = vpop.permute.xlu0 %871 }
 0x223   : > { %v1089_v59 = vpop.f32.mrb[18].mxu1  ;;  %v877_v54 = vpop.permute.xlu1 %876 }
 0x224   : > { %v3610_v0 = vadd.f32 %v1087_v53, %v3434_v33  ;;  %v1090_v11 = vadd.f32 %v1089_v59, %v847_v58  ;;  %v1091_v10 = vpop.f32.mrb[19].mxu1  ;;  %1410 = vmatpush1.bf16.msra.mxu0 %v1176_v18 }
 0x225   : > { %1411 = vmatprep.subr.bf16.mxu0 %v2956_v2 }
 0x226   : > { %v3614_v12 = vadd.f32 %v1090_v11, %v3437_v35  ;;  %v1161_v5 = vmax.f32 %v3610_v0, 0.0 }
 0x228   : > { %v1162_v6 = vmax.f32 %v3614_v12, 0.0 }
 0x229   : > { %v1094_v7 = vpop.f32.mrb[20].mxu1 }
 0x22a   : > { %v1177_v33 = vpack.c.bf16 %v1162_v6, %v1161_v5  ;;  %v1095_v45 = vadd.f32 %v1094_v7, %v852_v44  ;;  %v1096_v15 = vpop.f32.mrb[21].mxu1 }
 0x22b   : > { %v1097_v26 = vpop.f32.mrb[22].mxu1 }
 0x22c   : > { %v3623_v55 = vadd.f32 %v1095_v45, %v3446_v43  ;;  %v1098_v35 = vadd.f32 %v1097_v26, %v857_v21  ;;  %v1099_v25 = vpop.f32.mrb[23].mxu1  ;;  %1412 = vmatpush1.bf16.msra.mxu0 %v1177_v33  ;;  %v882_v33 = vpop.permute.xlu0 %881 }
 0x22d   : > { %1413 = vmatprep.subr.bf16.mxu0 %v2956_v2  ;;  %v887_v26 = vpop.permute.xlu1 %886 }
 0x22e   : > { %v3627_v24 = vadd.f32 %v1098_v35, %v3441_v38  ;;  %v1163_v27 = vmax.f32 %v3623_v55, 0.0 }
 0x230   : > { %v1164_v28 = vmax.f32 %v3627_v24, 0.0 }
 0x231   : > { %v1102_v30 = vpop.f32.mrb[24].mxu1 }
 0x232   : > { %v1178_v43 = vpack.c.bf16 %v1164_v28, %v1163_v27  ;;  %v1103_v36 = vadd.f32 %v1102_v30, %v862_v50  ;;  %v1104_v37 = vpop.f32.mrb[25].mxu1 }
 0x233   : > { %v1105_v39 = vpop.f32.mrb[26].mxu1  ;;  %v892_v37 = vpop.permute.xlu0 %891 }
 0x234   : > { %v3636_v40 = vadd.f32 %v1103_v36, %v3452_v56  ;;  %v1106_v38 = vadd.f32 %v1105_v39, %v867_v1  ;;  %v1107_v41 = vpop.f32.mrb[27].mxu1  ;;  %1414 = vmatpush1.bf16.msra.mxu0 %v1178_v43 }
 0x235   : > { %1415 = vmatprep.subr.bf16.mxu0 %v2956_v2  ;;  %v897_v41 = vpop.permute.xlu1 %896 }
 0x236   : > { %v3640_v42 = vadd.f32 %v1106_v38, %v3455_v8  ;;  %v1165_v3 = vmax.f32 %v3636_v40, 0.0 }
 0x238   : > { %v1166_v47 = vmax.f32 %v3640_v42, 0.0 }
 0x239   : > { %v1110_v9 = vpop.f32.mrb[28].mxu1 }
 0x23a   : > { %v1179_v56 = vpack.c.bf16 %v1166_v47, %v1165_v3  ;;  %v1111_v18 = vadd.f32 %v1110_v9, %v872_v52  ;;  %v1112_v53 = vpop.f32.mrb[29].mxu1 }
 0x23b   : > { %v1113_v58 = vpop.f32.mrb[30].mxu1 }
 0x23c   : > { %v3649_v59 = vadd.f32 %v1111_v18, %v3464_v4  ;;  %v1114_v8 = vadd.f32 %v1113_v58, %v877_v54  ;;  %v1115_v11 = vpop.f32.mrb[31].mxu1  ;;  %1416 = vmatpush1.bf16.msra.mxu0 %v1179_v56 }
 0x23d   : > { %1417 = vmatprep.subr.bf16.mxu0 %v2956_v2  ;;  %v2838_v11 = vld [vmem:[%s4198_s2 + $0xc4] ss:$8 sps:$4 sm:$0xff]  }
 0x23e   : > { %v3653_v10 = vadd.f32 %v1114_v8, %v3459_v61  ;;  %v1167_v44 = vmax.f32 %v3649_v59, 0.0  ;;  %v2835_v8 = vld [vmem:[%s4198_s2 + $0xb4] ss:$8 sps:$4 sm:$0xff]  }
 0x240   : > { %v1168_v7 = vmax.f32 %v3653_v10, 0.0 }
 0x241   : > { %v1118_v45 = vpop.f32.mrb[32].mxu1 }
 0x242   : > { %v1180_v4 = vpack.c.bf16 %v1168_v7, %v1167_v44  ;;  %v1119_v15 = vadd.f32 %v1118_v45, %v882_v33  ;;  %v1120_v21 = vpop.f32.mrb[33].mxu1  ;;  %v2840_v33 = vld [vmem:[%s4198_s2 + $0xc0] ss:$8 sps:$4 sm:$0xff]   ;;  %v2841_v45 = vld [vmem:[%s4198_s2 + $0xd4] ss:$8 sps:$4 sm:$0xff]  }
 0x243   : > { %v1121_v35 = vpop.f32.mrb[34].mxu1  ;;  %v2846_v21 = vld [vmem:[%s4198_s2 + $0xe0] ss:$8 sps:$4 sm:$0xff]  }
 0x244   : > { %v3662_v25 = vadd.f32 %v1119_v15, %v3470_v17  ;;  %v1122_v61 = vadd.f32 %v1121_v35, %v887_v26  ;;  %v1123_v50 = vpop.f32.mrb[35].mxu1  ;;  %1418 = vmatpush1.bf16.msra.mxu0 %v1180_v4  ;;  %v2843_v4 = vld [vmem:[%s4198_s2 + $0xd0] ss:$8 sps:$4 sm:$0xff]   ;;  %v2844_v15 = vld [vmem:[%s4198_s2 + $0xe4] ss:$8 sps:$4 sm:$0xff]  }
 0x245   : > { %1419 = vmatprep.subr.bf16.mxu0 %v2956_v2  ;;  %v2847_v26 = vld [vmem:[%s4198_s2 + $0xf4] ss:$8 sps:$4 sm:$0xff]   ;;  %v2849_v35 = vld [vmem:[%s4198_s2 + $0xf0] ss:$8 sps:$4 sm:$0xff]   ;;  %v2852_v50 = vld [vmem:[%s4198_s2 + $0x100] ss:$8 sps:$4 sm:$0xff]  }
 0x246   : > { %v3666_v30 = vadd.f32 %v1122_v61, %v3473_v19  ;;  %v1169_v43 = vmax.f32 %v3662_v25, 0.0  ;;  %v2850_v61 = vld [vmem:[%s4198_s2 + $0x104] ss:$8 sps:$4 sm:$0xff]  }
 0x248   : > { %v1170_v36 = vmax.f32 %v3666_v30, 0.0 }
 0x249   : > { %v1126_v1 = vpop.f32.mrb[36].mxu1 }
 0x24a   : > { %v1181_v17 = vpack.c.bf16 %v1170_v36, %v1169_v43  ;;  %v1127_v39 = vadd.f32 %v1126_v1, %v892_v37  ;;  %v1128_v38 = vpop.f32.mrb[37].mxu1  ;;  %v2853_v37 = vld [vmem:[%s4198_s2 + $0x114] ss:$8 sps:$4 sm:$0xff]   ;;  %v2855_v1 = vld [vmem:[%s4198_s2 + $0x110] ss:$8 sps:$4 sm:$0xff]  }
 0x24b   : > { %v1129_v52 = vpop.f32.mrb[38].mxu1  ;;  %v2859_v38 = vld [vmem:[%s4198_s2 + $0x134] ss:$8 sps:$4 sm:$0xff]  }
 0x24c   : > { %v3675_v9 = vadd.f32 %v1127_v39, %v3482_v23  ;;  %v1130_v19 = vadd.f32 %v1129_v52, %v897_v41  ;;  %v1131_v56 = vpop.f32.mrb[39].mxu1  ;;  %1420 = vmatpush1.bf16.msra.mxu0 %v1181_v17  ;;  %v2832_v23 = vld [vmem:[%s4198_s2 + $0xa0] ss:$8 sps:$4 sm:$0xff]   ;;  %v2856_v17 = vld [vmem:[%s4198_s2 + $0x124] ss:$8 sps:$4 sm:$0xff]  }
 0x24d   : > { %1421 = vmatprep.subr.bf16.mxu0 %v2956_v2  ;;  %v2858_v39 = vld [vmem:[%s4198_s2 + $0x120] ss:$8 sps:$4 sm:$0xff]   ;;  %v2861_v41 = vld [vmem:[%s4198_s2 + $0x130] ss:$8 sps:$4 sm:$0xff]   ;;  %v2864_v52 = vld [vmem:[%s4198_s2 + $0x144] ss:$8 sps:$4 sm:$0xff]  }
 0x24e   : > { %v3679_v18 = vadd.f32 %v1130_v19, %v3477_v14  ;;  %v1171_v53 = vmax.f32 %v3675_v9, 0.0  ;;  %v2837_v14 = vld [vmem:[%s4198_s2 + $0xb0] ss:$8 sps:$4 sm:$0xff]   ;;  %2658 = vmatprep.mubr.msk.bf16.mxu1 %vm989_vm1, %v2864_v52  ;;  %v1186_v19 = vpop.permute.xlu0 %1185 }
 0x250   : > { %v1172_v54 = vmax.f32 %v3679_v18, 0.0  ;;  %v2865_v18 = vld [vmem:[%s4198_s2 + $0x154] ss:$8 sps:$4 sm:$0xff]  }
 0x252   : > { %v1182_v58 = vpack.c.bf16 %v1172_v54, %v1171_v53 }
 0x254   : > { %1422 = vmatpush1.bf16.msra.mxu0 %v1182_v58 }
 0x255   : > { %2169 = vmatprep.subr.bf16.mxu0 %v2956_v2 }
 0x257   : > { %1436 = vmatmul.mubr.bf16.vlgmr.msra.gmra.mrb[20].mxu0 %v2832_v23 }
 0x258   : > { %2629 = vmatprep.mubr.msk.bf16.mxu0 %vm989_vm1, %v2835_v8  ;;  %v1191_v8 = vpop.permute.xlu1 %1190 }
 0x25f   : > { %1444 = vmatmul.mubr.bf16.gmra.mrb[24].mxu0 %v2837_v14 }
 0x260   : > { %2630 = vmatprep.mubr.msk.bf16.mxu0 %vm989_vm1, %v2838_v11 }
 0x267   : > { %1452 = vmatmul.mubr.bf16.gmra.mrb[28].mxu0 %v2840_v33 }
 0x268   : > { %2631 = vmatprep.mubr.msk.bf16.mxu0 %vm989_vm1, %v2841_v45 }
 0x26f   : > { %1460 = vmatmul.mubr.bf16.gmra.mrb[32].mxu0 %v2843_v4 }
 0x270   : > { %2632 = vmatprep.mubr.msk.bf16.mxu0 %vm989_vm1, %v2844_v15 }
 0x277   : > { %1468 = vmatmul.mubr.bf16.gmra.mrb[36].mxu0 %v2846_v21 }
 0x278   : > { %2633 = vmatprep.mubr.msk.bf16.mxu0 %vm989_vm1, %v2847_v26  ;;  %v1196_v26 = vpop.permute.xlu0 %1195 }
 0x27f   : > { %1476 = vmatmul.mubr.bf16.gmra.mrb[40].mxu0 %v2849_v35 }
 0x280   : > { %2634 = vmatprep.mubr.msk.bf16.mxu0 %vm989_vm1, %v2850_v61 }
 0x287   : > { %1484 = vmatmul.mubr.bf16.gmra.mrb[44].mxu0 %v2852_v50  ;;  %v1201_v50 = vpop.permute.xlu1 %1200 }
 0x288   : > { %2635 = vmatprep.mubr.msk.bf16.mxu0 %vm989_vm1, %v2853_v37 }
 0x28f   : > { %1492 = vmatmul.mubr.bf16.gmra.mrb[48].mxu0 %v2855_v1 }
 0x290   : > { %2636 = vmatprep.mubr.msk.bf16.mxu0 %vm989_vm1, %v2856_v17 }
 0x297   : > { %1500 = vmatmul.mubr.bf16.gmra.mrb[52].mxu0 %v2858_v39 }
 0x298   : > { %2637 = vmatprep.mubr.msk.bf16.mxu0 %vm989_vm1, %v2859_v38 }
 0x29f   : > { %1508 = vmatmul.mubr.bf16.gmra.mrb[56].mxu0 %v2861_v41  ;;  %v1206_v41 = vpop.permute.xlu0 %1205 }
 0x32a   : > { %v1437_v56 = vpop.f32.mrb[20].mxu0 }
 0x32b   : > { %v1438_v58 = vadd.f32 %v1437_v56, %v1186_v19  ;;  %v1439_v23 = vpop.f32.mrb[21].mxu0  ;;  %v1211_v56 = vpop.permute.xlu1 %1210 }
 0x32c   : > { %v1440_v14 = vpop.f32.mrb[22].mxu0 }
 0x32d   : > { %v3760_v11 = vadd.f32 %v1438_v58, %v1153_v62  ;;  %v1441_v33 = vadd.f32 %v1440_v14, %v1191_v8  ;;  %v1442_v45 = vpop.f32.mrb[23].mxu0 }
 0x32e   : > { %v1216_v45 = vpop.permute.xlu0 %1215 }
 0x32f   : > { %v3764_v4 = vadd.f32 %v1441_v33, %v1154_v63  ;;  %v1536_v15 = vmax.f32 %v3760_v11, 0.0 }
 0x331   : > { %v1537_v21 = vmax.f32 %v3764_v4, 0.0 }
 0x332   : > { %v1445_v35 = vpop.f32.mrb[24].mxu0 }
 0x333   : > { %v1556_v61 = vpack.c.bf16 %v1537_v21, %v1536_v15  ;;  %v1446_v57 = vadd.f32 %v1445_v35, %v1196_v26  ;;  %v1447_v62 = vpop.f32.mrb[25].mxu0 }
 0x334   : > { %v1448_v37 = vpop.f32.mrb[26].mxu0 }
 0x335   : > { %v3774_v60 = vadd.f32 %v1446_v57, %v1155_v22  ;;  %v1449_v63 = vadd.f32 %v1448_v37, %v1201_v50  ;;  %v1450_v1 = vpop.f32.mrb[27].mxu0  ;;  %1787 = vmatpush1.bf16.msra.mxu1 %v1556_v61  ;;  %v1221_v61 = vpop.permute.xlu1 %1220 }
 0x336   : > { %1788 = vmatprep.subr.bf16.mxu1 %v2956_v2  ;;  %v1226_v1 = vpop.permute.xlu0 %1225 }
 0x337   : > { %v3779_v17 = vadd.f32 %v1449_v63, %v1156_v20  ;;  %v1538_v39 = vmax.f32 %v3774_v60, 0.0 }
 0x339   : > { %v1539_v38 = vmax.f32 %v3779_v17, 0.0 }
 0x33a   : > { %v1453_v52 = vpop.f32.mrb[28].mxu0 }
 0x33b   : > { %v1557_v13 = vpack.c.bf16 %v1539_v38, %v1538_v39  ;;  %v1454_v22 = vadd.f32 %v1453_v52, %v1206_v41  ;;  %v1455_v19 = vpop.f32.mrb[29].mxu0 }
 0x33c   : > { %v1456_v58 = vpop.f32.mrb[30].mxu0 }
 0x33d   : > { %v3789_v16 = vadd.f32 %v1454_v22, %v1157_v32  ;;  %v1457_v20 = vadd.f32 %v1456_v58, %v1211_v56  ;;  %v1458_v23 = vpop.f32.mrb[31].mxu0  ;;  %1789 = vmatpush1.bf16.msra.mxu1 %v1557_v13  ;;  %v1231_v13 = vpop.permute.xlu1 %1230 }
 0x33e   : > { %1790 = vmatprep.subr.bf16.mxu1 %v2956_v2  ;;  %v1236_v23 = vpop.permute.xlu0 %1235 }
 0x33f   : > { %v3794_v8 = vadd.f32 %v1457_v20, %v1158_v34  ;;  %v1540_v14 = vmax.f32 %v3789_v16, 0.0 }
 0x341   : > { %v1541_v33 = vmax.f32 %v3794_v8, 0.0 }
 0x342   : > { %v1461_v26 = vpop.f32.mrb[32].mxu0 }
 0x343   : > { %v1558_v29 = vpack.c.bf16 %v1541_v33, %v1540_v14  ;;  %v1462_v32 = vadd.f32 %v1461_v26, %v1216_v45  ;;  %v1463_v35 = vpop.f32.mrb[33].mxu0 }
 0x344   : > { %v1464_v57 = vpop.f32.mrb[34].mxu0 }
 0x345   : > { %v3804_v31 = vadd.f32 %v1462_v32, %v1159_v49  ;;  %v1465_v34 = vadd.f32 %v1464_v57, %v1221_v61  ;;  %v1466_v62 = vpop.f32.mrb[35].mxu0  ;;  %1791 = vmatpush1.bf16.msra.mxu1 %v1558_v29  ;;  %v1241_v29 = vpop.permute.xlu1 %1240 }
 0x346   : > { %1792 = vmatprep.subr.bf16.mxu1 %v2956_v2  ;;  %v1246_v62 = vpop.permute.xlu0 %1245 }
 0x347   : > { %v3809_v50 = vadd.f32 %v1465_v34, %v1160_v51  ;;  %v1542_v37 = vmax.f32 %v3804_v31, 0.0 }
 0x349   : > { %v1543_v63 = vmax.f32 %v3809_v50, 0.0 }
 0x34a   : > { %v1469_v41 = vpop.f32.mrb[36].mxu0 }
 0x34b   : > { %v1559_v46 = vpack.c.bf16 %v1543_v63, %v1542_v37  ;;  %v1470_v49 = vadd.f32 %v1469_v41, %v1226_v1  ;;  %v1471_v52 = vpop.f32.mrb[37].mxu0 }
 0x34c   : > { %v1472_v22 = vpop.f32.mrb[38].mxu0 }
 0x34d   : > { %v3819_v48 = vadd.f32 %v1470_v49, %v1161_v5  ;;  %v1473_v51 = vadd.f32 %v1472_v22, %v1231_v13  ;;  %v1474_v19 = vpop.f32.mrb[39].mxu0  ;;  %1793 = vmatpush1.bf16.msra.mxu1 %v1559_v46  ;;  %v1251_v46 = vpop.permute.xlu1 %1250 }
 0x34e   : > { %1794 = vmatprep.subr.bf16.mxu1 %v2956_v2  ;;  %v1256_v19 = vpop.permute.xlu0 %1255 }
 0x34f   : > { %v3824_v56 = vadd.f32 %v1473_v51, %v1162_v6  ;;  %v1544_v58 = vmax.f32 %v3819_v48, 0.0 }
 0x351   : > { %v1545_v20 = vmax.f32 %v3824_v56, 0.0 }
 0x352   : > { %v1477_v45 = vpop.f32.mrb[40].mxu0 }
 0x353   : > { %v1560_v0 = vpack.c.bf16 %v1545_v20, %v1544_v58  ;;  %v1478_v5 = vadd.f32 %v1477_v45, %v1236_v23  ;;  %v1479_v26 = vpop.f32.mrb[41].mxu0 }
 0x354   : > { %v1480_v32 = vpop.f32.mrb[42].mxu0 }
 0x355   : > { %v3834_v12 = vadd.f32 %v1478_v5, %v1163_v27  ;;  %v1481_v6 = vadd.f32 %v1480_v32, %v1241_v29  ;;  %v1482_v35 = vpop.f32.mrb[43].mxu0  ;;  %1795 = vmatpush1.bf16.msra.mxu1 %v1560_v0  ;;  %v1261_v0 = vpop.permute.xlu1 %1260 }
 0x356   : > { %1796 = vmatprep.subr.bf16.mxu1 %v2956_v2  ;;  %v1266_v35 = vpop.permute.xlu0 %1265 }
 0x357   : > { %v3839_v61 = vadd.f32 %v1481_v6, %v1164_v28  ;;  %v1546_v57 = vmax.f32 %v3834_v12, 0.0 }
 0x359   : > { %v1547_v34 = vmax.f32 %v3839_v61, 0.0 }
 0x35a   : > { %v1485_v1 = vpop.f32.mrb[44].mxu0 }
 0x35b   : > { %v1561_v55 = vpack.c.bf16 %v1547_v34, %v1546_v57  ;;  %v1486_v27 = vadd.f32 %v1485_v1, %v1246_v62  ;;  %v1487_v41 = vpop.f32.mrb[45].mxu0 }
 0x35c   : > { %v1488_v49 = vpop.f32.mrb[46].mxu0 }
 0x35d   : > { %v3849_v24 = vadd.f32 %v1486_v27, %v1165_v3  ;;  %v1489_v28 = vadd.f32 %v1488_v49, %v1251_v46  ;;  %v1490_v52 = vpop.f32.mrb[47].mxu0  ;;  %1797 = vmatpush1.bf16.msra.mxu1 %v1561_v55  ;;  %v1271_v55 = vpop.permute.xlu1 %1270 }
 0x35e   : > { %1798 = vmatprep.subr.bf16.mxu1 %v2956_v2  ;;  %v1276_v52 = vpop.permute.xlu0 %1275 }
 0x35f   : > { %v3854_v13 = vadd.f32 %v1489_v28, %v1166_v47  ;;  %v1548_v22 = vmax.f32 %v3849_v24, 0.0 }
 0x361   : > { %v1549_v51 = vmax.f32 %v3854_v13, 0.0 }
 0x362   : > { %v1493_v23 = vpop.f32.mrb[48].mxu0 }
 0x363   : > { %v1562_v40 = vpack.c.bf16 %v1549_v51, %v1548_v22  ;;  %v1494_v3 = vadd.f32 %v1493_v23, %v1256_v19  ;;  %v1495_v45 = vpop.f32.mrb[49].mxu0 }
 0x364   : > { %v1496_v5 = vpop.f32.mrb[50].mxu0 }
 0x365   : > { %v3864_v42 = vadd.f32 %v1494_v3, %v1167_v44  ;;  %v1497_v47 = vadd.f32 %v1496_v5, %v1261_v0  ;;  %v1498_v26 = vpop.f32.mrb[51].mxu0  ;;  %1799 = vmatpush1.bf16.msra.mxu1 %v1562_v40  ;;  %v1281_v40 = vpop.permute.xlu1 %1280 }
 0x366   : > { %1800 = vmatprep.subr.bf16.mxu1 %v2956_v2  ;;  %v2868_v26 = vld [vmem:[%s4198_s2 + $0x164] ss:$8 sps:$4 sm:$0xff]  }
 0x367   : > { %v3869_v29 = vadd.f32 %v1497_v47, %v1168_v7  ;;  %v1550_v32 = vmax.f32 %v3864_v42, 0.0 }
 0x369   : > { %v1551_v6 = vmax.f32 %v3869_v29, 0.0 }
 0x36a   : > { %v1501_v62 = vpop.f32.mrb[52].mxu0 }
 0x36b   : > { %v1563_v59 = vpack.c.bf16 %v1551_v6, %v1550_v32  ;;  %v1502_v44 = vadd.f32 %v1501_v62, %v1266_v35  ;;  %v1503_v1 = vpop.f32.mrb[53].mxu0  ;;  %v2870_v35 = vld [vmem:[%s4198_s2 + $0x160] ss:$8 sps:$4 sm:$0xff]   ;;  %v2871_v62 = vld [vmem:[%s4198_s2 + $0x174] ss:$8 sps:$4 sm:$0xff]  }
 0x36c   : > { %v1504_v27 = vpop.f32.mrb[54].mxu0  ;;  %v2876_v1 = vld [vmem:[%s4198_s2 + $0x180] ss:$8 sps:$4 sm:$0xff]  }
 0x36d   : > { %v3879_v10 = vadd.f32 %v1502_v44, %v1169_v43  ;;  %v1505_v7 = vadd.f32 %v1504_v27, %v1271_v55  ;;  %v1506_v41 = vpop.f32.mrb[55].mxu0  ;;  %1801 = vmatpush1.bf16.msra.mxu1 %v1563_v59  ;;  %v2873_v59 = vld [vmem:[%s4198_s2 + $0x170] ss:$8 sps:$4 sm:$0xff]   ;;  %v2874_v44 = vld [vmem:[%s4198_s2 + $0x184] ss:$8 sps:$4 sm:$0xff]  }
 0x36e   : > { %1802 = vmatprep.subr.bf16.mxu1 %v2956_v2  ;;  %v2877_v55 = vld [vmem:[%s4198_s2 + $0x194] ss:$8 sps:$4 sm:$0xff]   ;;  %v2879_v27 = vld [vmem:[%s4198_s2 + $0x190] ss:$8 sps:$4 sm:$0xff]   ;;  %v2882_v41 = vld [vmem:[%s4198_s2 + $0x1a0] ss:$8 sps:$4 sm:$0xff]  }
 0x36f   : > { %v3884_v46 = vadd.f32 %v1505_v7, %v1170_v36  ;;  %v1552_v49 = vmax.f32 %v3879_v10, 0.0  ;;  %v2880_v7 = vld [vmem:[%s4198_s2 + $0x1a4] ss:$8 sps:$4 sm:$0xff]  }
 0x371   : > { %v1553_v28 = vmax.f32 %v3884_v46, 0.0 }
 0x372   : > { %v1509_v19 = vpop.f32.mrb[56].mxu0 }
 0x373   : > { %v1564_v25 = vpack.c.bf16 %v1553_v28, %v1552_v49  ;;  %v1510_v43 = vadd.f32 %v1509_v19, %v1276_v52  ;;  %v1511_v23 = vpop.f32.mrb[57].mxu0  ;;  %v2883_v52 = vld [vmem:[%s4198_s2 + $0x1b4] ss:$8 sps:$4 sm:$0xff]   ;;  %v2885_v19 = vld [vmem:[%s4198_s2 + $0x1b0] ss:$8 sps:$4 sm:$0xff]  }
 0x374   : > { %v1512_v3 = vpop.f32.mrb[58].mxu0  ;;  %v2889_v23 = vld [vmem:[%s4198_s2 + $0x1d4] ss:$8 sps:$4 sm:$0xff]  }
 0x375   : > { %v3894_v30 = vadd.f32 %v1510_v43, %v1171_v53  ;;  %v1513_v36 = vadd.f32 %v1512_v3, %v1281_v40  ;;  %v1514_v45 = vpop.f32.mrb[59].mxu0  ;;  %1803 = vmatpush1.bf16.msra.mxu1 %v1564_v25  ;;  %v2862_v53 = vld [vmem:[%s4198_s2 + $0x140] ss:$8 sps:$4 sm:$0xff]   ;;  %v2886_v25 = vld [vmem:[%s4198_s2 + $0x1c4] ss:$8 sps:$4 sm:$0xff]  }
 0x376   : > { %1804 = vmatprep.subr.bf16.mxu1 %v2956_v2  ;;  %v2888_v43 = vld [vmem:[%s4198_s2 + $0x1c0] ss:$8 sps:$4 sm:$0xff]   ;;  %v2891_v40 = vld [vmem:[%s4198_s2 + $0x1d0] ss:$8 sps:$4 sm:$0xff]   ;;  %v2894_v3 = vld [vmem:[%s4198_s2 + $0x1e4] ss:$8 sps:$4 sm:$0xff]   ;;  %v1569_v45 = vpop.permute.xlu0 %1568 }
 0x377   : > { %v3899_v0 = vadd.f32 %v1513_v36, %v1172_v54  ;;  %v1554_v5 = vmax.f32 %v3894_v30, 0.0  ;;  %v2867_v54 = vld [vmem:[%s4198_s2 + $0x150] ss:$8 sps:$4 sm:$0xff]   ;;  %v2897_v36 = vld [vmem:[%s4198_s2 + $0x274] ss:$8 sps:$4 sm:$0xff]   ;;  %2688 = vmatprep.mubr.msk.bf16.mxu0 %vm989_vm1, %v2894_v3 }
 0x378   : > { %v2895_v30 = vld [vmem:[%s4198_s2 + $0x270] ss:$8 sps:$4 sm:$0xff]  }
 0x379   : > { %v1555_v47 = vmax.f32 %v3899_v0, 0.0  ;;  %v2900_v0 = vld [vmem:[%s4198_s2 + $0x1f0] ss:$8 sps:$4 sm:$0xff]  }
 0x37b   : > { %v1565_v9 = vpack.c.bf16 %v1555_v47, %v1554_v5 }
 0x37d   : > { %1805 = vmatpush1.bf16.msra.mxu1 %v1565_v9 }
 0x37e   : > { %2745 = vmatprep.subr.bf16.mxu1 %v2956_v2 }
 0x380   : > { %1819 = vmatmul.mubr.bf16.vlgmr.msra.gmra.mrb[40].mxu1 %v2862_v53 }
 0x381   : > { %2659 = vmatprep.mubr.msk.bf16.mxu1 %vm989_vm1, %v2865_v18 }
 0x388   : > { %1827 = vmatmul.mubr.bf16.gmra.mrb[44].mxu1 %v2867_v54  ;;  %v1574_v54 = vpop.permute.xlu1 %1573 }
 0x389   : > { %2660 = vmatprep.mubr.msk.bf16.mxu1 %vm989_vm1, %v2868_v26 }
 0x390   : > { %1835 = vmatmul.mubr.bf16.gmra.mrb[48].mxu1 %v2870_v35 }
 0x391   : > { %2661 = vmatprep.mubr.msk.bf16.mxu1 %vm989_vm1, %v2871_v62 }
 0x398   : > { %1843 = vmatmul.mubr.bf16.gmra.mrb[52].mxu1 %v2873_v59 }
 0x399   : > { %2662 = vmatprep.mubr.msk.bf16.mxu1 %vm989_vm1, %v2874_v44 }
 0x3a0   : > { %1851 = vmatmul.mubr.bf16.gmra.mrb[56].mxu1 %v2876_v1 }
 0x3a1   : > { %2663 = vmatprep.mubr.msk.bf16.mxu1 %vm989_vm1, %v2877_v55 }
 0x3a8   : > { %1859 = vmatmul.mubr.bf16.gmra.mrb[60].mxu1 %v2879_v27  ;;  %v1579_v27 = vpop.permute.xlu0 %1578 }
 0x3a9   : > { %2664 = vmatprep.mubr.msk.bf16.mxu1 %vm989_vm1, %v2880_v7 }
 0x3ac   : > { %v1589_v3 = vpop.permute.xlu0 %1588 }
 0x3b0   : > { %1867 = vmatmul.mubr.bf16.gmra.mrb[64].mxu1 %v2882_v41 }
 0x3b1   : > { %2665 = vmatprep.mubr.msk.bf16.mxu1 %vm989_vm1, %v2883_v52 }
 0x3b8   : > { %1875 = vmatmul.mubr.bf16.gmra.mrb[68].mxu1 %v2885_v19 }
 0x3b9   : > { %2666 = vmatprep.mubr.msk.bf16.mxu1 %vm989_vm1, %v2886_v25  ;;  %v1584_v25 = vpop.permute.xlu1 %1583 }
 0x3bd   : > { %v1594_v60 = vpop.permute.xlu1 %1593 }
 0x3c0   : > { %1883 = vmatmul.mubr.bf16.gmra.mrb[72].mxu1 %v2888_v43 }
 0x3c1   : > { %2667 = vmatprep.mubr.msk.bf16.mxu1 %vm989_vm1, %v2889_v23  ;;  %v1604_v16 = vpop.permute.xlu1 %1603 }
 0x3c5   : > { %v1614_v31 = vpop.permute.xlu1 %1613 }
 0x3c8   : > { %1891 = vmatmul.mubr.bf16.gmra.mrb[76].mxu1 %v2891_v40 }
 0x3c9   : > { %2697 = vmatprep.mubr.msk.bf16.mxu1 %vm989_vm1, %v2897_v36  ;;  %v1624_v48 = vpop.permute.xlu1 %1623 }
 0x3cd   : > { %v1634_v12 = vpop.permute.xlu1 %1633 }
 0x3d1   : > { %v1644_v24 = vpop.permute.xlu1 %1643 }
 0x3d5   : > { %v1654_v42 = vpop.permute.xlu1 %1653 }
 0x3d9   : > { %v1664_v10 = vpop.permute.xlu1 %1663 }
 0x453   : > { %v1820_v9 = vpop.f32.mrb[40].mxu1 }
 0x454   : > { %v1821_v53 = vadd.f32 %v1820_v9, %v1569_v45  ;;  %v1822_v18 = vpop.f32.mrb[41].mxu1 }
 0x455   : > { %v1823_v26 = vpop.f32.mrb[42].mxu1 }
 0x456   : > { %v1899_v35 = vadd.f32 %v1821_v53, %v1536_v15  ;;  %v1824_v62 = vadd.f32 %v1823_v26, %v1574_v54  ;;  %v1825_v59 = vpop.f32.mrb[43].mxu1 }
 0x458   : > { %v1900_v44 = vadd.f32 %v1824_v62, %v1537_v21  ;;  %v1919_v1 = vmax.f32 %v1899_v35, 0.0  ;;  %v1599_v62 = vpop.permute.xlu0 %1598 }
 0x45a   : > { %v1920_v55 = vmax.f32 %v1900_v44, 0.0 }
 0x45b   : > { %v1828_v7 = vpop.f32.mrb[44].mxu1 }
 0x45c   : > { %v1939_v41 = vpack.c.bf16 %v1920_v55, %v1919_v1  ;;  %v1829_v52 = vadd.f32 %v1828_v7, %v1579_v27  ;;  %v1830_v19 = vpop.f32.mrb[45].mxu1 }
 0x45d   : > { %v1831_v43 = vpop.f32.mrb[46].mxu1  ;;  %v1609_v19 = vpop.permute.xlu0 %1608 }
 0x45e   : > { %v1901_v23 = vadd.f32 %v1829_v52, %v1538_v39  ;;  %v1832_v40 = vadd.f32 %v1831_v43, %v1584_v25  ;;  %v1833_v11 = vpop.f32.mrb[47].mxu1  ;;  %2170 = vmatpush1.bf16.msra.mxu0 %v1939_v41  ;;  %2755 = vmatpush1.bf16.msra.mxu1 %v1939_v41 }
 0x45f   : > { %2171 = vmatprep.subr.bf16.mxu0 %v2956_v2  ;;  %2746 = vmatprep.subr.bf16.mxu1 %v2956_v2 }
 0x460   : > { %v1902_v4 = vadd.f32 %v1832_v40, %v1539_v38  ;;  %v1921_v15 = vmax.f32 %v1901_v23, 0.0 }
 0x462   : > { %v1922_v21 = vmax.f32 %v1902_v4, 0.0 }
 0x463   : > { %v1836_v36 = vpop.f32.mrb[48].mxu1 }
 0x464   : > { %v1940_v45 = vpack.c.bf16 %v1922_v21, %v1921_v15  ;;  %v1837_v9 = vadd.f32 %v1836_v36, %v1589_v3  ;;  %v1838_v53 = vpop.f32.mrb[49].mxu1  ;;  %v1619_v3 = vpop.permute.xlu0 %1618 }
 0x465   : > { %v1839_v39 = vpop.f32.mrb[50].mxu1 }
 0x466   : > { %v1903_v18 = vadd.f32 %v1837_v9, %v1540_v14  ;;  %v1840_v54 = vadd.f32 %v1839_v39, %v1594_v60  ;;  %v1841_v26 = vpop.f32.mrb[51].mxu1  ;;  %2172 = vmatpush1.bf16.msra.mxu0 %v1940_v45  ;;  %2756 = vmatpush1.bf16.msra.mxu1 %v1940_v45 }
 0x467   : > { %2173 = vmatprep.subr.bf16.mxu0 %v2956_v2  ;;  %2747 = vmatprep.subr.bf16.mxu1 %v2956_v2 }
 0x468   : > { %v1904_v17 = vadd.f32 %v1840_v54, %v1541_v33  ;;  %v1923_v38 = vmax.f32 %v1903_v18, 0.0  ;;  %v1629_v26 = vpop.permute.xlu0 %1628 }
 0x46a   : > { %v1924_v35 = vmax.f32 %v1904_v17, 0.0 }
 0x46b   : > { %v1844_v59 = vpop.f32.mrb[52].mxu1 }
 0x46c   : > { %v1941_v44 = vpack.c.bf16 %v1924_v35, %v1923_v38  ;;  %v1845_v1 = vadd.f32 %v1844_v59, %v1599_v62  ;;  %v1846_v55 = vpop.f32.mrb[53].mxu1 }
 0x46d   : > { %v1847_v14 = vpop.f32.mrb[54].mxu1 }
 0x46e   : > { %v1905_v27 = vadd.f32 %v1845_v1, %v1542_v37  ;;  %v1848_v7 = vadd.f32 %v1847_v14, %v1604_v16  ;;  %v1849_v41 = vpop.f32.mrb[55].mxu1  ;;  %2174 = vmatpush1.bf16.msra.mxu0 %v1941_v44  ;;  %2757 = vmatpush1.bf16.msra.mxu1 %v1941_v44  ;;  %v1639_v16 = vpop.permute.xlu0 %1638 }
 0x46f   : > { %2175 = vmatprep.subr.bf16.mxu0 %v2956_v2  ;;  %2748 = vmatprep.subr.bf16.mxu1 %v2956_v2 }
 0x470   : > { %v1906_v8 = vadd.f32 %v1848_v7, %v1543_v63  ;;  %v1925_v33 = vmax.f32 %v1905_v27, 0.0 }
 0x472   : > { %v1926_v52 = vmax.f32 %v1906_v8, 0.0 }
 0x473   : > { %v1852_v25 = vpop.f32.mrb[56].mxu1 }
 0x474   : > { %v1942_v43 = vpack.c.bf16 %v1926_v52, %v1925_v33  ;;  %v1853_v23 = vadd.f32 %v1852_v25, %v1609_v19  ;;  %v1854_v40 = vpop.f32.mrb[57].mxu1  ;;  %v1649_v25 = vpop.permute.xlu0 %1648 }
 0x475   : > { %v1855_v37 = vpop.f32.mrb[58].mxu1 }
 0x476   : > { %v1907_v11 = vadd.f32 %v1853_v23, %v1544_v58  ;;  %v1856_v4 = vadd.f32 %v1855_v37, %v1614_v31  ;;  %v1857_v15 = vpop.f32.mrb[59].mxu1  ;;  %2176 = vmatpush1.bf16.msra.mxu0 %v1942_v43  ;;  %2758 = vmatpush1.bf16.msra.mxu1 %v1942_v43 }
 0x477   : > { %2177 = vmatprep.subr.bf16.mxu0 %v2956_v2  ;;  %2749 = vmatprep.subr.bf16.mxu1 %v2956_v2 }
 0x478   : > { %v1908_v50 = vadd.f32 %v1856_v4, %v1545_v20  ;;  %v1927_v63 = vmax.f32 %v1907_v11, 0.0 }
 0x47a   : > { %v1928_v21 = vmax.f32 %v1908_v50, 0.0  ;;  %v1659_v50 = vpop.permute.xlu0 %1658 }
 0x47b   : > { %v1860_v36 = vpop.f32.mrb[60].mxu1 }
 0x47c   : > { %v1943_v45 = vpack.c.bf16 %v1928_v21, %v1927_v63  ;;  %v1861_v9 = vadd.f32 %v1860_v36, %v1619_v3  ;;  %v1862_v53 = vpop.f32.mrb[61].mxu1 }
 0x47d   : > { %v1863_v58 = vpop.f32.mrb[62].mxu1 }
 0x47e   : > { %v1909_v60 = vadd.f32 %v1861_v9, %v1546_v57  ;;  %v1864_v39 = vadd.f32 %v1863_v58, %v1624_v48  ;;  %v1865_v18 = vpop.f32.mrb[63].mxu1  ;;  %2178 = vmatpush1.bf16.msra.mxu0 %v1943_v45  ;;  %2759 = vmatpush1.bf16.msra.mxu1 %v1943_v45 }
 0x47f   : > { %2179 = vmatprep.subr.bf16.mxu0 %v2956_v2  ;;  %2750 = vmatprep.subr.bf16.mxu1 %v2956_v2  ;;  %v2906_v18 = vld [vmem:[%s4198_s2 + $0x210] ss:$8 sps:$4 sm:$0xff]  }
 0x480   : > { %v1910_v56 = vadd.f32 %v1864_v39, %v1547_v34  ;;  %v1929_v20 = vmax.f32 %v1909_v60, 0.0  ;;  %v2892_v60 = vld [vmem:[%s4198_s2 + $0x1e0] ss:$8 sps:$4 sm:$0xff]   ;;  %v2904_v39 = vld [vmem:[%s4198_s2 + $0x214] ss:$8 sps:$4 sm:$0xff]  }
 0x482   : > { %v1930_v54 = vmax.f32 %v1910_v56, 0.0  ;;  %v2907_v56 = vld [vmem:[%s4198_s2 + $0x224] ss:$8 sps:$4 sm:$0xff]  }
 0x483   : > { %v1868_v17 = vpop.f32.mrb[64].mxu1 }
 0x484   : > { %v1944_v38 = vpack.c.bf16 %v1930_v54, %v1929_v20  ;;  %v1869_v35 = vadd.f32 %v1868_v17, %v1629_v26  ;;  %v1870_v62 = vpop.f32.mrb[65].mxu1  ;;  %v2909_v20 = vld [vmem:[%s4198_s2 + $0x220] ss:$8 sps:$4 sm:$0xff]   ;;  %v2910_v54 = vld [vmem:[%s4198_s2 + $0x234] ss:$8 sps:$4 sm:$0xff]  }
 0x485   : > { %v1871_v57 = vpop.f32.mrb[66].mxu1  ;;  %v2912_v26 = vld [vmem:[%s4198_s2 + $0x230] ss:$8 sps:$4 sm:$0xff]   ;;  %v2913_v17 = vld [vmem:[%s4198_s2 + $0x244] ss:$8 sps:$4 sm:$0xff]  }
 0x486   : > { %v1911_v59 = vadd.f32 %v1869_v35, %v1548_v22  ;;  %v1872_v44 = vadd.f32 %v1871_v57, %v1634_v12  ;;  %v1873_v1 = vpop.f32.mrb[67].mxu1  ;;  %2180 = vmatpush1.bf16.msra.mxu0 %v1944_v38  ;;  %2760 = vmatpush1.bf16.msra.mxu1 %v1944_v38  ;;  %v2915_v38 = vld [vmem:[%s4198_s2 + $0x240] ss:$8 sps:$4 sm:$0xff]   ;;  %v2916_v35 = vld [vmem:[%s4198_s2 + $0x254] ss:$8 sps:$4 sm:$0xff]  }
 0x487   : > { %2181 = vmatprep.subr.bf16.mxu0 %v2956_v2  ;;  %2751 = vmatprep.subr.bf16.mxu1 %v2956_v2  ;;  %v2918_v62 = vld [vmem:[%s4198_s2 + $0x250] ss:$8 sps:$4 sm:$0xff]   ;;  %v2919_v12 = vld [vmem:[%s4198_s2 + $0x264] ss:$8 sps:$4 sm:$0xff]   ;;  %v2921_v57 = vld [vmem:[%s4198_s2 + $0x260] ss:$8 sps:$4 sm:$0xff]  }
 0x488   : > { %v1912_v61 = vadd.f32 %v1872_v44, %v1549_v51  ;;  %v1931_v34 = vmax.f32 %v1911_v59, 0.0  ;;  %v1952_v59 = vpop.permute.xlu0 %1951  ;;  %v1957_v44 = vpop.permute.xlu1 %1956 }
 0x48a   : > { %v1932_v55 = vmax.f32 %v1912_v61, 0.0 }
 0x48b   : > { %v1876_v14 = vpop.f32.mrb[68].mxu1 }
 0x48c   : > { %v1945_v27 = vpack.c.bf16 %v1932_v55, %v1931_v34  ;;  %v1877_v7 = vadd.f32 %v1876_v14, %v1639_v16  ;;  %v1878_v41 = vpop.f32.mrb[69].mxu1  ;;  %v4102_v1 = vpop.permute.xlu0 %1961 }
 0x48d   : > { %v1879_v22 = vpop.f32.mrb[70].mxu1  ;;  %v4104_v61 = vpop.permute.xlu1 %1966 }
 0x48e   : > { %v1913_v8 = vadd.f32 %v1877_v7, %v1550_v32  ;;  %v1880_v33 = vadd.f32 %v1879_v22, %v1644_v24  ;;  %v1881_v52 = vpop.f32.mrb[71].mxu1  ;;  %2182 = vmatpush1.bf16.msra.mxu0 %v1945_v27  ;;  %2761 = vmatpush1.bf16.msra.mxu1 %v1945_v27 }
 0x48f   : > { %2183 = vmatprep.subr.bf16.mxu0 %v2956_v2  ;;  %2752 = vmatprep.subr.bf16.mxu1 %v2956_v2 }
 0x490   : > { %v1914_v13 = vadd.f32 %v1880_v33, %v1551_v6  ;;  %v1933_v51 = vmax.f32 %v1913_v8, 0.0  ;;  %v4106_v34 = vpop.permute.xlu0 %1971 }
 0x491   : > { %v4108_v55 = vpop.permute.xlu1 %1976 }
 0x492   : > { %v1934_v19 = vmax.f32 %v1914_v13, 0.0 }
 0x493   : > { %v1884_v43 = vpop.f32.mrb[72].mxu1 }
 0x494   : > { %v1946_v23 = vpack.c.bf16 %v1934_v19, %v1933_v51  ;;  %v1885_v40 = vadd.f32 %v1884_v43, %v1649_v25  ;;  %v1886_v31 = vpop.f32.mrb[73].mxu1  ;;  %v4110_v16 = vpop.permute.xlu0 %1981 }
 0x495   : > { %v1887_v32 = vpop.f32.mrb[74].mxu1  ;;  %v4112_v14 = vpop.permute.xlu1 %1986 }
 0x496   : > { %v1915_v37 = vadd.f32 %v1885_v40, %v1552_v49  ;;  %v1888_v11 = vadd.f32 %v1887_v32, %v1654_v42  ;;  %v1889_v4 = vpop.f32.mrb[75].mxu1  ;;  %2184 = vmatpush1.bf16.msra.mxu0 %v1946_v23  ;;  %2762 = vmatpush1.bf16.msra.mxu1 %v1946_v23 }
 0x497   : > { %2185 = vmatprep.subr.bf16.mxu0 %v2956_v2  ;;  %2753 = vmatprep.subr.bf16.mxu1 %v2956_v2 }
 0x498   : > { %v1916_v29 = vadd.f32 %v1888_v11, %v1553_v28  ;;  %v1935_v6 = vmax.f32 %v1915_v37, 0.0  ;;  %v1992_v27 = vpop.permute.xlu0 %1991 }
 0x499   : > { %v1997_v51 = vpop.permute.xlu1 %1996 }
 0x49a   : > { %v1936_v15 = vmax.f32 %v1916_v29, 0.0 }
 0x49b   : > { %v1892_v63 = vpop.f32.mrb[76].mxu1 }
 0x49c   : > { %v1947_v21 = vpack.c.bf16 %v1936_v15, %v1935_v6  ;;  %v1893_v3 = vadd.f32 %v1892_v63, %v1659_v50  ;;  %v1894_v36 = vpop.f32.mrb[77].mxu1  ;;  %v2002_v19 = vpop.permute.xlu0 %2001 }
 0x49d   : > { %v1895_v49 = vpop.f32.mrb[78].mxu1  ;;  %v2007_v23 = vpop.permute.xlu1 %2006 }
 0x49e   : > { %v1917_v45 = vadd.f32 %v1893_v3, %v1554_v5  ;;  %v1896_v9 = vadd.f32 %v1895_v49, %v1664_v10  ;;  %v1897_v53 = vpop.f32.mrb[79].mxu1  ;;  %2186 = vmatpush1.bf16.msra.mxu0 %v1947_v21  ;;  %2763 = vmatpush1.bf16.msra.mxu1 %v1947_v21  ;;  %v2901_v5 = vld [vmem:[%s4198_s2 + $0x204] ss:$8 sps:$4 sm:$0xff]  }
 0x49f   : > { %2187 = vmatprep.subr.bf16.mxu0 %v2956_v2  ;;  %2754 = vmatprep.subr.bf16.mxu1 %v2956_v2  ;;  %v2898_v2 = vld [vmem:[%s4198_s2 + $0x1f4] ss:$8 sps:$4 sm:$0xff]  }
 0x4a0   : > { %v1918_v46 = vadd.f32 %v1896_v9, %v1555_v47  ;;  %v1937_v28 = vmax.f32 %v1917_v45, 0.0  ;;  %v2903_v47 = vld [vmem:[%s4198_s2 + $0x200] ss:$8 sps:$4 sm:$0xff]   ;;  %v4114_v42 = vpop.permute.xlu0 %2011 }
 0x4a1   : > { %v4116_v32 = vpop.permute.xlu1 %2016 }
 0x4a2   : > { %v1938_v48 = vmax.f32 %v1918_v46, 0.0 }
 0x4a4   : > { %v1948_v58 = vpack.c.bf16 %v1938_v48, %v1937_v28  ;;  %v4122_v6 = vpop.permute.xlu0 %2021 }
 0x4a5   : > { %v4124_v15 = vpop.permute.xlu1 %2026 }
 0x4a6   : > { %2188 = vmatpush1.bf16.msra.mxu0 %v1948_v58  ;;  %2764 = vmatpush1.bf16.msra.mxu1 %v1948_v58 }
 0x4a8   : > { %v4128_v21 = vpop.permute.xlu0 %2031 }
 0x4a9   : > { %2202 = vmatmul.mubr.bf16.vlgmr.msra.gmra.mrb[60].mxu0 %v2892_v60  ;;  %2274 = vmatmul.mubr.bf16.vlgmr.msra.gmra.mrb[80].mxu1 %v2895_v30  ;;  %v4132_v10 = vpop.permute.xlu1 %2036 }
 0x4aa   : > { %2689 = vmatprep.mubr.msk.bf16.mxu0 %vm989_vm1, %v2898_v2 }
 0x4ac   : > { %v2042_v49 = vpop.permute.xlu0 %2041 }
 0x4ad   : > { %v2047_v28 = vpop.permute.xlu1 %2046 }
 0x4b1   : > { %2210 = vmatmul.mubr.bf16.gmra.mrb[64].mxu0 %v2900_v0 }
 0x4b2   : > { %2690 = vmatprep.mubr.msk.bf16.mxu0 %vm989_vm1, %v2901_v5 }
 0x4b9   : > { %2218 = vmatmul.mubr.bf16.gmra.mrb[68].mxu0 %v2903_v47 }
 0x4ba   : > { %2691 = vmatprep.mubr.msk.bf16.mxu0 %vm989_vm1, %v2904_v39  ;;  %v2922_v39 = vld [vmem:[%s3032_s11 + $0x40] sm:$0xff] }
 0x4c1   : > { %2226 = vmatmul.mubr.bf16.gmra.mrb[72].mxu0 %v2906_v18 }
 0x4c2   : > { %2692 = vmatprep.mubr.msk.bf16.mxu0 %vm989_vm1, %v2907_v56 }
 0x4c9   : > { %2234 = vmatmul.mubr.bf16.gmra.mrb[76].mxu0 %v2909_v20 }
 0x4ca   : > { %2693 = vmatprep.mubr.msk.bf16.mxu0 %vm989_vm1, %v2910_v54 }
 0x4d1   : > { %2242 = vmatmul.mubr.bf16.gmra.mrb[80].mxu0 %v2912_v26 }
 0x4d2   : > { %2694 = vmatprep.mubr.msk.bf16.mxu0 %vm989_vm1, %v2913_v17  ;;  %v2923_v17 = vld [vmem:[%s3032_s11 + $0x48] sm:$0xff] }
 0x4d9   : > { %2250 = vmatmul.mubr.bf16.gmra.mrb[84].mxu0 %v2915_v38 }
 0x4da   : > { %2695 = vmatprep.mubr.msk.bf16.mxu0 %vm989_vm1, %v2916_v35 }
 0x4e1   : > { %2258 = vmatmul.mubr.bf16.gmra.mrb[88].mxu0 %v2918_v62 }
 0x4e2   : > { %2696 = vmatprep.mubr.msk.bf16.mxu0 %vm989_vm1, %v2919_v12 }
 0x4e9   : > { %2266 = vmatmul.mubr.bf16.gmra.mrb[92].mxu0 %v2921_v57 }
 0x57c   : > { %v2203_v7 = vpop.f32.mrb[60].mxu0  ;;  %v2275_v41 = vpop.f32.mrb[80].mxu1 }
 0x57d   : > { %v2205_v24 = vpop.f32.mrb[61].mxu0  ;;  %v2277_v22 = vpop.f32.mrb[81].mxu1  ;;  %v2276_v9 = vadd.f32 %v2275_v41, %v2042_v49  ;;  %v2204_v58 = vadd.f32 %v2203_v7, %v1952_v59 }
 0x57e   : > { %v2206_v8 = vpop.f32.mrb[62].mxu0  ;;  %v2278_v33 = vpop.f32.mrb[82].mxu1 }
 0x57f   : > { %v2208_v52 = vpop.f32.mrb[63].mxu0  ;;  %v2280_v13 = vpop.f32.mrb[83].mxu1  ;;  %v2279_v60 = vadd.f32 %v2278_v33, %v2047_v28  ;;  %v2310_v5 = vmax.f32 %v2276_v9, 0.0  ;;  %v2207_v47 = vadd.f32 %v2206_v8, %v1957_v44  ;;  %v2282_v20 = vmax.f32 %v2204_v58, 0.0  ;;  %v2925_v33 = vld [vmem:[%s3032_s11 + $0x8] sm:$0xff]  ;;  %v2927_v9 = vld [vmem:[%s3032_s11 + $0x18] sm:$0xff] }
 0x581   : > { %v2311_v54 = vmax.f32 %v2279_v60, 0.0  ;;  %v2283_v62 = vmax.f32 %v2207_v47, 0.0 }
 0x583   : > { %v2293_v52 = vadd.f32 %v2925_v33, %v2283_v62 }
 0x584   : > { %v2211_v25 = vpop.f32.mrb[64].mxu0 }
 0x585   : > { %v2213_v43 = vpop.f32.mrb[65].mxu0  ;;  %v2212_v41 = vadd.f32 %v2211_v25, %v4102_v1 }
 0x586   : > { %v2214_v40 = vpop.f32.mrb[66].mxu0 }
 0x587   : > { %v2216_v31 = vpop.f32.mrb[67].mxu0  ;;  %v2215_v13 = vadd.f32 %v2214_v40, %v4104_v61  ;;  %v2284_v43 = vmax.f32 %v2212_v41, 0.0 }
 0x58c   : > { %v4118_v37 = vpop.f32.mrb[68].mxu0 }
 0x58d   : > { %v2221_v11 = vpop.f32.mrb[69].mxu0  ;;  %v2220_v61 = vadd.f32 %v4118_v37, %v4106_v34 }
 0x58e   : > { %v4120_v4 = vpop.f32.mrb[70].mxu0 }
 0x58f   : > { %v2224_v29 = vpop.f32.mrb[71].mxu0 }
 0x590   : > { %v2285_v29 = vmax.f32 %v2215_v13, 0.0 }
 0x594   : > { %v4126_v50 = vpop.f32.mrb[72].mxu0 }
 0x595   : > { %v2229_v63 = vpop.f32.mrb[73].mxu0 }
 0x596   : > { %v4130_v3 = vpop.f32.mrb[74].mxu0  ;;  %v2926_v63 = vld [vmem:[%s3032_s11 + $0x10] sm:$0xff] }
 0x597   : > { %v2232_v36 = vpop.f32.mrb[75].mxu0 }
 0x598   : > { %v2294_v36 = vadd.f32 %v2926_v63, %v2284_v43 }
 0x59c   : > { %v2235_v45 = vpop.f32.mrb[76].mxu0 }
 0x59d   : > { %v2236_v53 = vadd.f32 %v2235_v45, %v1992_v27  ;;  %v2237_v46 = vpop.f32.mrb[77].mxu0  ;;  %v2924_v27 = vld [vmem:[%s3032_s11] sm:$0xff] }
 0x59e   : > { %v2238_v48 = vpop.f32.mrb[78].mxu0  ;;  %v2292_v7 = vadd.f32 %v2924_v27, %v2282_v20  ;;  %v2223_v46 = vadd.f32 %v4120_v4, %v4108_v55  ;;  %v2228_v55 = vadd.f32 %v4126_v50, %v4110_v16 }
 0x59f   : > { %v2290_v30 = vmax.f32 %v2236_v53, 0.0  ;;  %v2239_v2 = vadd.f32 %v2238_v48, %v1997_v51  ;;  %v2240_v0 = vpop.f32.mrb[79].mxu0  ;;  %v2295_v53 = vadd.f32 %v2927_v9, %v2285_v29  ;;  %v2286_v48 = vmax.f32 %v2220_v61, 0.0 }
 0x5a1   : > { %v2300_v18 = vadd.f32 %v2922_v39, %v2290_v30  ;;  %v2291_v56 = vmax.f32 %v2239_v2, 0.0  ;;  %v2287_v30 = vmax.f32 %v2223_v46, 0.0  ;;  %v2928_v2 = vld [vmem:[%s3032_s11 + $0x20] sm:$0xff]  ;;  %v2929_v39 = vld [vmem:[%s3032_s11 + $0x28] sm:$0xff] }
 0x5a2   : > { %v2296_v0 = vadd.f32 %v2928_v2, %v2286_v48 }
 0x5a3   : > { %v2320_v26 = vsub.f32 %v2300_v18, %v2310_v5  ;;  %v2301_v38 = vadd.f32 %v2923_v17, %v2291_v56  ;;  %v2297_v18 = vadd.f32 %v2929_v39, %v2287_v30  ;;  %v2231_v56 = vadd.f32 %v4130_v3, %v4112_v14 }
 0x5a4   : > { %v2243_v35 = vpop.f32.mrb[80].mxu0 }
 0x5a5   : > { %2331 = vst.msk [vmem:[%s4140_s24 + $0x40] sm:$0xff] %vm2322_vm2, %v2320_v26  ;;  %v2321_v12 = vsub.f32 %v2301_v38, %v2311_v54  ;;  %v2244_v57 = vadd.f32 %v2243_v35, %v2002_v19  ;;  %v2245_v59 = vpop.f32.mrb[81].mxu0  ;;  %v2288_v54 = vmax.f32 %v2228_v55, 0.0  ;;  %v2289_v16 = vmax.f32 %v2231_v56, 0.0  ;;  %v2930_v35 = vld [vmem:[%s3032_s11 + $0x30] sm:$0xff] }
 0x5a6   : > { %v2246_v44 = vpop.f32.mrb[82].mxu0 }
 0x5a7   : > { %2332 = vst.msk [vmem:[%s4140_s24 + $0x48] sm:$0xff] %vm2322_vm2, %v2321_v12  ;;  %v2302_v24 = vmax.f32 %v2244_v57, 0.0  ;;  %v2247_v22 = vadd.f32 %v2246_v44, %v2007_v23  ;;  %v2248_v8 = vpop.f32.mrb[83].mxu0  ;;  %v2298_v62 = vadd.f32 %v2930_v35, %v2288_v54  ;;  %v2931_v57 = vld [vmem:[%s3032_s11 + $0x38] sm:$0xff] }
 0x5a8   : > { %v2299_v59 = vadd.f32 %v2931_v57, %v2289_v16 }
 0x5a9   : > { %v2312_v51 = vsub.f32 %v2292_v7, %v2302_v24  ;;  %v2303_v19 = vmax.f32 %v2247_v22, 0.0 }
 0x5ab   : > { %2323 = vst.msk [vmem:[%s4140_s24] sm:$0xff] %vm2322_vm2, %v2312_v51  ;;  %v2313_v31 = vsub.f32 %v2293_v52, %v2303_v19 }
 0x5ac   : > { %v2251_v11 = vpop.f32.mrb[84].mxu0 }
 0x5ad   : > { %2324 = vst.msk [vmem:[%s4140_s24 + $0x8] sm:$0xff] %vm2322_vm2, %v2313_v31  ;;  %v2252_v1 = vadd.f32 %v2251_v11, %v4114_v42  ;;  %v2253_v25 = vpop.f32.mrb[85].mxu0 }
 0x5ae   : > { %v2254_v23 = vpop.f32.mrb[86].mxu0 }
 0x5af   : > { %v2304_v40 = vmax.f32 %v2252_v1, 0.0  ;;  %v2255_v49 = vadd.f32 %v2254_v23, %v4116_v32  ;;  %v2256_v45 = vpop.f32.mrb[87].mxu0 }
 0x5b1   : > { %v2314_v28 = vsub.f32 %v2294_v36, %v2304_v40  ;;  %v2305_v42 = vmax.f32 %v2255_v49, 0.0 }
 0x5b3   : > { %2325 = vst.msk [vmem:[%s4140_s24 + $0x10] sm:$0xff] %vm2322_vm2, %v2314_v28  ;;  %v2315_v58 = vsub.f32 %v2295_v53, %v2305_v42 }
 0x5b4   : > { %v2259_v60 = vpop.f32.mrb[88].mxu0 }
 0x5b5   : > { %2326 = vst.msk [vmem:[%s4140_s24 + $0x18] sm:$0xff] %vm2322_vm2, %v2315_v58  ;;  %v2260_v34 = vadd.f32 %v2259_v60, %v4122_v6  ;;  %v2261_v32 = vpop.f32.mrb[89].mxu0 }
 0x5b6   : > { %v2262_v37 = vpop.f32.mrb[90].mxu0 }
 0x5b7   : > { %v2306_v4 = vmax.f32 %v2260_v34, 0.0  ;;  %v2263_v5 = vadd.f32 %v2262_v37, %v4124_v15  ;;  %v2264_v47 = vpop.f32.mrb[91].mxu0 }
 0x5b9   : > { %v2316_v20 = vsub.f32 %v2296_v0, %v2306_v4  ;;  %v2307_v6 = vmax.f32 %v2263_v5, 0.0 }
 0x5bb   : > { %2327 = vst.msk [vmem:[%s4140_s24 + $0x20] sm:$0xff] %vm2322_vm2, %v2316_v20  ;;  %v2317_v26 = vsub.f32 %v2297_v18, %v2307_v6 }
 0x5bc   : > { %v2267_v17 = vpop.f32.mrb[92].mxu0 }
 0x5bd   : > { %2328 = vst.msk [vmem:[%s4140_s24 + $0x28] sm:$0xff] %vm2322_vm2, %v2317_v26  ;;  %v2268_v15 = vadd.f32 %v2267_v17, %v4128_v21  ;;  %v2269_v50 = vpop.f32.mrb[93].mxu0 }
 0x5be   : > { %v2270_v38 = vpop.f32.mrb[94].mxu0 }
 0x5bf   : > { %v2308_v14 = vmax.f32 %v2268_v15, 0.0  ;;  %v2271_v3 = vadd.f32 %v2270_v38, %v4132_v10  ;;  %v2272_v12 = vpop.f32.mrb[95].mxu0 }
 0x5c1   : > { %v2318_v44 = vsub.f32 %v2298_v62, %v2308_v14  ;;  %v2309_v27 = vmax.f32 %v2271_v3, 0.0 }
 0x5c3   : > { %2329 = vst.msk [vmem:[%s4140_s24 + $0x30] sm:$0xff] %vm2322_vm2, %v2318_v44  ;;  %v2319_v7 = vsub.f32 %v2299_v59, %v2309_v27 }
 0x5c5   : > { %2330 = vst.msk [vmem:[%s4140_s24 + $0x38] sm:$0xff] %vm2322_vm2, %v2319_v7 }
 0x5c6 PF: > { %s14_s17 = sadd.s32 1, %s2954_s17   ;;  %s4201_s15 = smov %s2950_s16 }
 0x5c7   : > { %p11_p5 = scmp.ge.s32.totalorder %s14_s17, 4   ;;  %s4202_s16 = smov %s4204_s18 }
 0x5c9   :  { %13 = sbr.rel (!%p11_p5) target bundleno = 2 (0x2), region = 73 }

</bundles_post_ra>
